<compile_context>
chip_gen: v7x
topology: tpu7x:2x2x1
jax: 0.10.0
libtpu: 0.0.40
codegen_flags: <defaults>
</compile_context>

<pallas_src>
import math

import jax
import jax.numpy as jnp
from jax.experimental import pallas as pl
from jax.experimental.pallas import tpu as pltpu


# ---------------------------------------------------------------------------
# in-kernel helpers
# ---------------------------------------------------------------------------
def _layer_norm(x, gamma, beta, eps=1e-5):
    mean = jnp.mean(x, axis=-1, keepdims=True)
    var = jnp.mean(jnp.square(x - mean), axis=-1, keepdims=True)
    return (x - mean) * jax.lax.rsqrt(var + eps) * gamma + beta


def _gelu_tanh(x):
    # tanh-approximate GELU; tanh runs on the EUP slot (cheap on TPU).
    c = math.sqrt(2.0 / math.pi)
    return 0.5 * x * (1.0 + jnp.tanh(c * (x + 0.044715 * x * x * x)))


# ---------------------------------------------------------------------------
# fused encoder-layer kernel: one batch element per grid step
# ---------------------------------------------------------------------------
def encoder_layer_kernel(x_ref, mask_ref,
                         wq_ref, bq_ref, wk_ref, bk_ref, wv_ref, bv_ref,
                         wo_ref, bo_ref,
                         ln1_g_ref, ln1_b_ref, ln2_g_ref, ln2_b_ref,
                         w1_ref, b1_ref, w2_ref, b2_ref,
                         out_ref,
                         *, n_heads, d_k, d_v):
    x = x_ref[0].astype(jnp.float32)                              # (S, d_model)
    s = x.shape[0]

    # additive mask bias, computed ONCE per grid step (broadcast over heads)
    neg_bias = jnp.where(mask_ref[0] != 0, jnp.float32(-1e9), jnp.float32(0.0))

    # ---------------- sublayer connection 1: x + MHA(LN1(x)) ----------------
    xn = _layer_norm(x, ln1_g_ref[...], ln1_b_ref[...])

    q = jnp.dot(xn, wq_ref[...], preferred_element_type=jnp.float32) + bq_ref[...]
    k = jnp.dot(xn, wk_ref[...], preferred_element_type=jnp.float32) + bk_ref[...]
    v = jnp.dot(xn, wv_ref[...], preferred_element_type=jnp.float32) + bv_ref[...]

    qh = jnp.transpose(q.reshape(s, n_heads, d_k), (1, 0, 2))     # (H, S, d_k)
    kh = jnp.transpose(k.reshape(s, n_heads, d_k), (1, 0, 2))     # (H, S, d_k)
    vh = jnp.transpose(v.reshape(s, n_heads, d_v), (1, 0, 2))     # (H, S, d_v)

    # batched head contraction (no per-head Python loop / lane slices)
    scores = jnp.einsum("hqd,hkd->hqk", qh, kh,
                        preferred_element_type=jnp.float32) * (1.0 / math.sqrt(d_k))
    scores = scores + neg_bias[None, :, :]                        # (H, S, S)

    m = jnp.max(scores, axis=-1, keepdims=True)
    e = jnp.exp(scores - m)
    attn = e * pl.reciprocal(jnp.sum(e, axis=-1, keepdims=True), approx=True)

    ctx = jnp.einsum("hqk,hkd->hqd", attn, vh,
                     preferred_element_type=jnp.float32)          # (H, S, d_v)

    # output projection without concatenation: batched per-head matmul + sum over H
    proj_h = jnp.einsum("hqd,hdm->hqm", ctx, wo_ref[...],
                        preferred_element_type=jnp.float32)       # (H, S, d_model)
    proj = jnp.sum(proj_h, axis=0) + bo_ref[...]

    y1 = x + proj                                                 # residual (pre-norm)

    # ---------------- sublayer connection 2: y1 + FFN(LN2(y1)) --------------
    yn = _layer_norm(y1, ln2_g_ref[...], ln2_b_ref[...])
    h = jnp.dot(yn, w1_ref[...], preferred_element_type=jnp.float32) + b1_ref[...]
    h = _gelu_tanh(h)
    ffn = jnp.dot(h, w2_ref[...], preferred_element_type=jnp.float32) + b2_ref[...]

    out_ref[0] = (y1 + ffn).astype(out_ref.dtype)


# ---------------------------------------------------------------------------
# wrapper
# ---------------------------------------------------------------------------
def _full_spec(shape):
    n = len(shape)
    return pl.BlockSpec(shape, lambda b, _n=n: (0,) * _n)


def normed_residual_encoder_layer(x, attn_mask, params, *, n_heads, d_k, d_v):
    B, S, d_model = x.shape
    assert params["wq"].shape == (d_model, n_heads * d_k)
    assert params["wv"].shape == (d_model, n_heads * d_v)
    # residual add requires the output projection to map back to d_model
    assert params["wo"].shape == (n_heads * d_v, d_model), \
        "wo must be (n_heads*d_v, d_model) so the residual add is well-defined"

    # fold the head structure into the output-projection weight once, host-side
    wo3 = params["wo"].reshape(n_heads, d_v, d_model)

    kernel = lambda *refs: encoder_layer_kernel(
        *refs, n_heads=n_heads, d_k=d_k, d_v=d_v)

    return pl.pallas_call(
        kernel,
        out_shape=jax.ShapeDtypeStruct((B, S, d_model), x.dtype),
        grid=(B,),
        in_specs=[
            pl.BlockSpec((1, S, d_model), lambda b: (b, 0, 0)),
            pl.BlockSpec((1, S, S), lambda b: (b, 0, 0)),
            _full_spec(params["wq"].shape), _full_spec(params["bq"].shape),
            _full_spec(params["wk"].shape), _full_spec(params["bk"].shape),
            _full_spec(params["wv"].shape), _full_spec(params["bv"].shape),
            _full_spec(wo3.shape), _full_spec(params["bo"].shape),
            _full_spec(params["ln1_g"].shape), _full_spec(params["ln1_b"].shape),
            _full_spec(params["ln2_g"].shape), _full_spec(params["ln2_b"].shape),
            _full_spec(params["w1"].shape), _full_spec(params["b1"].shape),
            _full_spec(params["w2"].shape), _full_spec(params["b2"].shape),
        ],
        out_specs=pl.BlockSpec((1, S, d_model), lambda b: (b, 0, 0)),
        compiler_params=pltpu.CompilerParams(
            dimension_semantics=("parallel",),
            vmem_limit_bytes=32 * 1024 * 1024),
    )(x, attn_mask,
      params["wq"], params["bq"], params["wk"], params["bk"],
      params["wv"], params["bv"], wo3, params["bo"],
      params["ln1_g"], params["ln1_b"], params["ln2_g"], params["ln2_b"],
      params["w1"], params["b1"], params["w2"], params["b2"])


# ---------------------------------------------------------------------------
# pure-JAX reference (same pre-norm semantics, same tanh-GELU)
# ---------------------------------------------------------------------------
def reference(x, attn_mask, p, *, n_heads, d_k, d_v):
    B, S, d_model = x.shape

    def ln(y, g, b, eps=1e-5):
        mu = jnp.mean(y, axis=-1, keepdims=True)
        var = jnp.mean((y - mu) ** 2, axis=-1, keepdims=True)
        return (y - mu) / jnp.sqrt(var + eps) * g + b

    # sublayer 1: x + MHA(LN1(x))
    xn = ln(x, p["ln1_g"][0], p["ln1_b"][0])
    q = (xn @ p["wq"] + p["bq"]).reshape(B, S, n_heads, d_k).transpose(0, 2, 1, 3)
    k = (xn @ p["wk"] + p["bk"]).reshape(B, S, n_heads, d_k).transpose(0, 2, 1, 3)
    v = (xn @ p["wv"] + p["bv"]).reshape(B, S, n_heads, d_v).transpose(0, 2, 1, 3)
    scores = jnp.einsum("bhqd,bhkd->bhqk", q, k) / math.sqrt(d_k)
    scores = jnp.where(attn_mask[:, None, :, :] != 0, -1e9, scores)
    attn = jax.nn.softmax(scores, axis=-1)
    ctx = jnp.einsum("bhqk,bhkd->bhqd", attn, v)
    ctx = ctx.transpose(0, 2, 1, 3).reshape(B, S, n_heads * d_v)
    y1 = x + (ctx @ p["wo"] + p["bo"])

    # sublayer 2: y1 + FFN(LN2(y1))
    yn = ln(y1, p["ln2_g"][0], p["ln2_b"][0])
    h = jax.nn.gelu(yn @ p["w1"] + p["b1"], approximate=True)
    return y1 + (h @ p["w2"] + p["b2"])


# ---------------------------------------------------------------------------
if __name__ == "__main__":
    B, S = 2, 8
    d_model, n_heads = 128, 4          # lane-dense feature dim (multiple of 128)
    d_k = d_v = d_model // n_heads     # 32
    d_ff = 256

    key = jax.random.PRNGKey(0)
    keys = jax.random.split(key, 16)

    def init(k, shape, scale=0.05):
        return (scale * jax.random.normal(k, shape)).astype(jnp.float32)

    params = {
        "wq": init(keys[0], (d_model, n_heads * d_k)),
        "bq": init(keys[1], (1, n_heads * d_k)),
        "wk": init(keys[2], (d_model, n_heads * d_k)),
        "bk": init(keys[3], (1, n_heads * d_k)),
        "wv": init(keys[4], (d_model, n_heads * d_v)),
        "bv": init(keys[5], (1, n_heads * d_v)),
        "wo": init(keys[6], (n_heads * d_v, d_model)),
        "bo": init(keys[7], (1, d_model)),
        "ln1_g": (1.0 + init(keys[8], (1, d_model), 0.02)).astype(jnp.float32),
        "ln1_b": init(keys[9], (1, d_model), 0.02),
        "ln2_g": (1.0 + init(keys[10], (1, d_model), 0.02)).astype(jnp.float32),
        "ln2_b": init(keys[11], (1, d_model), 0.02),
        "w1": init(keys[12], (d_model, d_ff)),
        "b1": init(keys[13], (1, d_ff)),
        "w2": init(keys[14], (d_ff, d_model)),
        "b2": init(keys[15], (1, d_model)),
    }

    x = jax.random.normal(jax.random.PRNGKey(42), (B, S, d_model), jnp.float32)

    # padding-style mask: batch 0 fully valid, batch 1 masks the last 2 key positions
    valid_len = jnp.array([S, S - 2])
    col = jnp.arange(S)[None, None, :]
    attn_mask = jnp.broadcast_to(
        (col >= valid_len[:, None, None]).astype(jnp.int32), (B, S, S))

    out = normed_residual_encoder_layer(x, attn_mask, params,
                                        n_heads=n_heads, d_k=d_k, d_v=d_v)
    out = jax.block_until_ready(out)

    ref = reference(x, attn_mask, params, n_heads=n_heads, d_k=d_k, d_v=d_v)
    assert out.shape == (B, S, d_model)
    assert jnp.allclose(out, ref, atol=5e-3, rtol=5e-3), \
        float(jnp.max(jnp.abs(out - ref)))

    print("KERNEL_OK")
</pallas_src>

<mosaic_0001>
module attributes {stable_mosaic.version = 11 : i64} {
  func.func @_lambda_(%arg0: i32, %arg1: memref<1x8x128xf32, #tpu.memory_space<vmem>>, %arg2: memref<1x8x8xi32, #tpu.memory_space<vmem>>, %arg3: memref<128x128xf32, #tpu.memory_space<vmem>>, %arg4: memref<1x128xf32, #tpu.memory_space<vmem>>, %arg5: memref<128x128xf32, #tpu.memory_space<vmem>>, %arg6: memref<1x128xf32, #tpu.memory_space<vmem>>, %arg7: memref<128x128xf32, #tpu.memory_space<vmem>>, %arg8: memref<1x128xf32, #tpu.memory_space<vmem>>, %arg9: memref<4x32x128xf32, #tpu.memory_space<vmem>>, %arg10: memref<1x128xf32, #tpu.memory_space<vmem>>, %arg11: memref<1x128xf32, #tpu.memory_space<vmem>>, %arg12: memref<1x128xf32, #tpu.memory_space<vmem>>, %arg13: memref<1x128xf32, #tpu.memory_space<vmem>>, %arg14: memref<1x128xf32, #tpu.memory_space<vmem>>, %arg15: memref<128x256xf32, #tpu.memory_space<vmem>>, %arg16: memref<1x256xf32, #tpu.memory_space<vmem>>, %arg17: memref<256x128xf32, #tpu.memory_space<vmem>>, %arg18: memref<1x128xf32, #tpu.memory_space<vmem>>, %arg19: memref<1x8x128xf32, #tpu.memory_space<vmem>>) attributes {dimension_semantics = [#tpu.dimension_semantics<parallel>], iteration_bounds = array<i64: 2>, scalar_prefetch = 0 : i64, scratch_operands = 0 : i64, tpu.core_type = #tpu.core_type<tc>, window_params = [{transform_indices = @transform_0, window_bounds = array<i64: 1, 8, 128>}, {transform_indices = @transform_1, window_bounds = array<i64: 1, 8, 8>}, {pipeline_mode = #tpu.pipeline_mode<synchronous>, transform_indices = @transform_2, window_bounds = array<i64: 128, 128>}, {pipeline_mode = #tpu.pipeline_mode<synchronous>, transform_indices = @transform_3, window_bounds = array<i64: 1, 128>}, {pipeline_mode = #tpu.pipeline_mode<synchronous>, transform_indices = @transform_4, window_bounds = array<i64: 128, 128>}, {pipeline_mode = #tpu.pipeline_mode<synchronous>, transform_indices = @transform_5, window_bounds = array<i64: 1, 128>}, {pipeline_mode = #tpu.pipeline_mode<synchronous>, transform_indices = @transform_6, window_bounds = array<i64: 128, 128>}, {pipeline_mode = #tpu.pipeline_mode<synchronous>, transform_indices = @transform_7, window_bounds = array<i64: 1, 128>}, {pipeline_mode = #tpu.pipeline_mode<synchronous>, transform_indices = @transform_8, window_bounds = array<i64: 4, 32, 128>}, {pipeline_mode = #tpu.pipeline_mode<synchronous>, transform_indices = @transform_9, window_bounds = array<i64: 1, 128>}, {pipeline_mode = #tpu.pipeline_mode<synchronous>, transform_indices = @transform_10, window_bounds = array<i64: 1, 128>}, {pipeline_mode = #tpu.pipeline_mode<synchronous>, transform_indices = @transform_11, window_bounds = array<i64: 1, 128>}, {pipeline_mode = #tpu.pipeline_mode<synchronous>, transform_indices = @transform_12, window_bounds = array<i64: 1, 128>}, {pipeline_mode = #tpu.pipeline_mode<synchronous>, transform_indices = @transform_13, window_bounds = array<i64: 1, 128>}, {pipeline_mode = #tpu.pipeline_mode<synchronous>, transform_indices = @transform_14, window_bounds = array<i64: 128, 256>}, {pipeline_mode = #tpu.pipeline_mode<synchronous>, transform_indices = @transform_15, window_bounds = array<i64: 1, 256>}, {pipeline_mode = #tpu.pipeline_mode<synchronous>, transform_indices = @transform_16, window_bounds = array<i64: 256, 128>}, {pipeline_mode = #tpu.pipeline_mode<synchronous>, transform_indices = @transform_17, window_bounds = array<i64: 1, 128>}, {transform_indices = @transform_18, window_bounds = array<i64: 1, 8, 128>}]} {
    %c0 = arith.constant 0 : index
    %c0_0 = arith.constant 0 : index
    %c0_1 = arith.constant 0 : index
    %0 = vector.load %arg1[%c0, %c0_0, %c0_1] : memref<1x8x128xf32, #tpu.memory_space<vmem>>, vector<1x8x128xf32>
    %1 = vector.shape_cast %0 : vector<1x8x128xf32> to vector<8x128xf32>
    %c0_2 = arith.constant 0 : index
    %c0_3 = arith.constant 0 : index
    %c0_4 = arith.constant 0 : index
    %2 = vector.load %arg2[%c0_2, %c0_3, %c0_4] : memref<1x8x8xi32, #tpu.memory_space<vmem>>, vector<1x8x8xi32>
    %3 = vector.shape_cast %2 : vector<1x8x8xi32> to vector<8x8xi32>
    %c0_i32 = arith.constant 0 : i32
    %4 = vector.broadcast %c0_i32 : i32 to vector<8x8xi32>
    %5 = arith.cmpi ne, %3, %4 : vector<8x8xi32>
    %cst = arith.constant -1.000000e+09 : f32
    %cst_5 = arith.constant 0.000000e+00 : f32
    %6 = vector.broadcast %cst : f32 to vector<8x8xf32>
    %7 = vector.broadcast %cst_5 : f32 to vector<8x8xf32>
    %8 = arith.select %5, %6, %7 : vector<8x8xi1>, vector<8x8xf32>
    %c0_6 = arith.constant 0 : index
    %c0_7 = arith.constant 0 : index
    %9 = vector.load %arg11[%c0_6, %c0_7] : memref<1x128xf32, #tpu.memory_space<vmem>>, vector<1x128xf32>
    %c0_8 = arith.constant 0 : index
    %c0_9 = arith.constant 0 : index
    %10 = vector.load %arg12[%c0_8, %c0_9] : memref<1x128xf32, #tpu.memory_space<vmem>>, vector<1x128xf32>
    %cst_10 = arith.constant dense<0.000000e+00> : vector<8xf32>
    %11 = vector.multi_reduction <add>, %1, %cst_10 [1] : vector<8x128xf32> to vector<8xf32>
    %12 = vector.shape_cast %11 : vector<8xf32> to vector<8x1xf32>
    %cst_11 = arith.constant 1.280000e+02 : f32
    %13 = vector.broadcast %cst_11 : f32 to vector<8x1xf32>
    %14 = arith.divf %12, %13 : vector<8x1xf32>
    %15 = vector.broadcast %14 : vector<8x1xf32> to vector<8x128xf32>
    %16 = arith.subf %1, %15 : vector<8x128xf32>
    %17 = arith.mulf %16, %16 : vector<8x128xf32>
    %cst_12 = arith.constant dense<0.000000e+00> : vector<8xf32>
    %18 = vector.multi_reduction <add>, %17, %cst_12 [1] : vector<8x128xf32> to vector<8xf32>
    %19 = vector.shape_cast %18 : vector<8xf32> to vector<8x1xf32>
    %cst_13 = arith.constant 1.280000e+02 : f32
    %20 = vector.broadcast %cst_13 : f32 to vector<8x1xf32>
    %21 = arith.divf %19, %20 : vector<8x1xf32>
    %22 = vector.broadcast %14 : vector<8x1xf32> to vector<8x128xf32>
    %23 = arith.subf %1, %22 : vector<8x128xf32>
    %cst_14 = arith.constant 9.99999974E-6 : f32
    %24 = vector.broadcast %cst_14 : f32 to vector<8x1xf32>
    %25 = arith.addf %21, %24 : vector<8x1xf32>
    %26 = math.rsqrt %25 : vector<8x1xf32>
    %27 = vector.broadcast %26 : vector<8x1xf32> to vector<8x128xf32>
    %28 = arith.mulf %23, %27 : vector<8x128xf32>
    %29 = vector.broadcast %9 : vector<1x128xf32> to vector<8x128xf32>
    %30 = arith.mulf %28, %29 : vector<8x128xf32>
    %31 = vector.broadcast %10 : vector<1x128xf32> to vector<8x128xf32>
    %32 = arith.addf %30, %31 : vector<8x128xf32>
    %c0_15 = arith.constant 0 : index
    %c0_16 = arith.constant 0 : index
    %33 = vector.load %arg3[%c0_15, %c0_16] : memref<128x128xf32, #tpu.memory_space<vmem>>, vector<128x128xf32>
    %cst_17 = arith.constant dense<0.000000e+00> : vector<8x128xf32>
    %34 = tpu.matmul %32, %33, %cst_17 {dimension_numbers = #tpu.dot_dimension_numbers<[1], [0], [0], [1], [0, 0, 1, 1], [], []>} : vector<8x128xf32>, vector<128x128xf32>, vector<8x128xf32> -> vector<8x128xf32>
    %c0_18 = arith.constant 0 : index
    %c0_19 = arith.constant 0 : index
    %35 = vector.load %arg4[%c0_18, %c0_19] : memref<1x128xf32, #tpu.memory_space<vmem>>, vector<1x128xf32>
    %36 = vector.broadcast %35 : vector<1x128xf32> to vector<8x128xf32>
    %37 = arith.addf %34, %36 : vector<8x128xf32>
    %c0_20 = arith.constant 0 : index
    %c0_21 = arith.constant 0 : index
    %38 = vector.load %arg5[%c0_20, %c0_21] : memref<128x128xf32, #tpu.memory_space<vmem>>, vector<128x128xf32>
    %cst_22 = arith.constant dense<0.000000e+00> : vector<8x128xf32>
    %39 = tpu.matmul %32, %38, %cst_22 {dimension_numbers = #tpu.dot_dimension_numbers<[1], [0], [0], [1], [0, 0, 1, 1], [], []>} : vector<8x128xf32>, vector<128x128xf32>, vector<8x128xf32> -> vector<8x128xf32>
    %c0_23 = arith.constant 0 : index
    %c0_24 = arith.constant 0 : index
    %40 = vector.load %arg6[%c0_23, %c0_24] : memref<1x128xf32, #tpu.memory_space<vmem>>, vector<1x128xf32>
    %41 = vector.broadcast %40 : vector<1x128xf32> to vector<8x128xf32>
    %42 = arith.addf %39, %41 : vector<8x128xf32>
    %c0_25 = arith.constant 0 : index
    %c0_26 = arith.constant 0 : index
    %43 = vector.load %arg7[%c0_25, %c0_26] : memref<128x128xf32, #tpu.memory_space<vmem>>, vector<128x128xf32>
    %cst_27 = arith.constant dense<0.000000e+00> : vector<8x128xf32>
    %44 = tpu.matmul %32, %43, %cst_27 {dimension_numbers = #tpu.dot_dimension_numbers<[1], [0], [0], [1], [0, 0, 1, 1], [], []>} : vector<8x128xf32>, vector<128x128xf32>, vector<8x128xf32> -> vector<8x128xf32>
    %c0_28 = arith.constant 0 : index
    %c0_29 = arith.constant 0 : index
    %45 = vector.load %arg8[%c0_28, %c0_29] : memref<1x128xf32, #tpu.memory_space<vmem>>, vector<1x128xf32>
    %46 = vector.broadcast %45 : vector<1x128xf32> to vector<8x128xf32>
    %47 = arith.addf %44, %46 : vector<8x128xf32>
    %48 = vector.shape_cast %37 : vector<8x128xf32> to vector<8x4x32xf32>
    %49 = tpu.transpose %48, [1, 0, 2] : vector<8x4x32xf32> -> vector<4x8x32xf32>
    %50 = vector.shape_cast %42 : vector<8x128xf32> to vector<8x4x32xf32>
    %51 = tpu.transpose %50, [1, 0, 2] : vector<8x4x32xf32> -> vector<4x8x32xf32>
    %52 = vector.shape_cast %47 : vector<8x128xf32> to vector<8x4x32xf32>
    %53 = tpu.transpose %52, [1, 0, 2] : vector<8x4x32xf32> -> vector<4x8x32xf32>
    "tpu.trace_start"() <{level = 10 : i32, message = "hqd,hkd->hqk"}> : () -> ()
    %cst_30 = arith.constant dense<0.000000e+00> : vector<4x8x8xf32>
    %54 = tpu.matmul %49, %51, %cst_30 {dimension_numbers = #tpu.dot_dimension_numbers<[2], [2], [1], [1], [0, 0, 0, 1, 1, 1], [0], [0]>} : vector<4x8x32xf32>, vector<4x8x32xf32>, vector<4x8x8xf32> -> vector<4x8x8xf32>
    "tpu.trace_stop"() : () -> ()
    %cst_31 = arith.constant 0.176776692 : f32
    %55 = vector.broadcast %cst_31 : f32 to vector<4x8x8xf32>
    %56 = arith.mulf %54, %55 : vector<4x8x8xf32>
    %57 = vector.shape_cast %8 : vector<8x8xf32> to vector<1x8x8xf32>
    %58 = vector.broadcast %57 : vector<1x8x8xf32> to vector<4x8x8xf32>
    %59 = arith.addf %56, %58 : vector<4x8x8xf32>
    %cst_32 = arith.constant dense<0xFF800000> : vector<4x8xf32>
    %60 = vector.multi_reduction <maximumf>, %59, %cst_32 [2] : vector<4x8x8xf32> to vector<4x8xf32>
    %61 = vector.shape_cast %60 : vector<4x8xf32> to vector<4x8x1xf32>
    %62 = vector.broadcast %61 : vector<4x8x1xf32> to vector<4x8x8xf32>
    %63 = arith.subf %59, %62 : vector<4x8x8xf32>
    %64 = math.exp %63 : vector<4x8x8xf32>
    %cst_33 = arith.constant dense<0.000000e+00> : vector<4x8xf32>
    %65 = vector.multi_reduction <add>, %64, %cst_33 [2] : vector<4x8x8xf32> to vector<4x8xf32>
    %66 = vector.shape_cast %65 : vector<4x8xf32> to vector<4x8x1xf32>
    %67 = tpu.reciprocal %66 {approx = true} : vector<4x8x1xf32> -> vector<4x8x1xf32>
    %68 = vector.broadcast %67 : vector<4x8x1xf32> to vector<4x8x8xf32>
    %69 = arith.mulf %64, %68 : vector<4x8x8xf32>
    "tpu.trace_start"() <{level = 10 : i32, message = "hqk,hkd->hqd"}> : () -> ()
    %cst_34 = arith.constant dense<0.000000e+00> : vector<4x8x32xf32>
    %70 = tpu.matmul %69, %53, %cst_34 {dimension_numbers = #tpu.dot_dimension_numbers<[2], [1], [1], [2], [0, 0, 0, 1, 1, 2], [0], [0]>} : vector<4x8x8xf32>, vector<4x8x32xf32>, vector<4x8x32xf32> -> vector<4x8x32xf32>
    "tpu.trace_stop"() : () -> ()
    %c0_35 = arith.constant 0 : index
    %c0_36 = arith.constant 0 : index
    %c0_37 = arith.constant 0 : index
    %71 = vector.load %arg9[%c0_35, %c0_36, %c0_37] : memref<4x32x128xf32, #tpu.memory_space<vmem>>, vector<4x32x128xf32>
    "tpu.trace_start"() <{level = 10 : i32, message = "hqd,hdm->hqm"}> : () -> ()
    %cst_38 = arith.constant dense<0.000000e+00> : vector<4x8x128xf32>
    %72 = tpu.matmul %70, %71, %cst_38 {dimension_numbers = #tpu.dot_dimension_numbers<[2], [1], [1], [2], [0, 0, 0, 1, 1, 2], [0], [0]>} : vector<4x8x32xf32>, vector<4x32x128xf32>, vector<4x8x128xf32> -> vector<4x8x128xf32>
    "tpu.trace_stop"() : () -> ()
    %cst_39 = arith.constant dense<0.000000e+00> : vector<8x128xf32>
    %73 = vector.multi_reduction <add>, %72, %cst_39 [0] : vector<4x8x128xf32> to vector<8x128xf32>
    %c0_40 = arith.constant 0 : index
    %c0_41 = arith.constant 0 : index
    %74 = vector.load %arg10[%c0_40, %c0_41] : memref<1x128xf32, #tpu.memory_space<vmem>>, vector<1x128xf32>
    %75 = vector.broadcast %74 : vector<1x128xf32> to vector<8x128xf32>
    %76 = arith.addf %73, %75 : vector<8x128xf32>
    %77 = arith.addf %1, %76 : vector<8x128xf32>
    %c0_42 = arith.constant 0 : index
    %c0_43 = arith.constant 0 : index
    %78 = vector.load %arg13[%c0_42, %c0_43] : memref<1x128xf32, #tpu.memory_space<vmem>>, vector<1x128xf32>
    %c0_44 = arith.constant 0 : index
    %c0_45 = arith.constant 0 : index
    %79 = vector.load %arg14[%c0_44, %c0_45] : memref<1x128xf32, #tpu.memory_space<vmem>>, vector<1x128xf32>
    %cst_46 = arith.constant dense<0.000000e+00> : vector<8xf32>
    %80 = vector.multi_reduction <add>, %77, %cst_46 [1] : vector<8x128xf32> to vector<8xf32>
    %81 = vector.shape_cast %80 : vector<8xf32> to vector<8x1xf32>
    %cst_47 = arith.constant 1.280000e+02 : f32
    %82 = vector.broadcast %cst_47 : f32 to vector<8x1xf32>
    %83 = arith.divf %81, %82 : vector<8x1xf32>
    %84 = vector.broadcast %83 : vector<8x1xf32> to vector<8x128xf32>
    %85 = arith.subf %77, %84 : vector<8x128xf32>
    %86 = arith.mulf %85, %85 : vector<8x128xf32>
    %cst_48 = arith.constant dense<0.000000e+00> : vector<8xf32>
    %87 = vector.multi_reduction <add>, %86, %cst_48 [1] : vector<8x128xf32> to vector<8xf32>
    %88 = vector.shape_cast %87 : vector<8xf32> to vector<8x1xf32>
    %cst_49 = arith.constant 1.280000e+02 : f32
    %89 = vector.broadcast %cst_49 : f32 to vector<8x1xf32>
    %90 = arith.divf %88, %89 : vector<8x1xf32>
    %91 = vector.broadcast %83 : vector<8x1xf32> to vector<8x128xf32>
    %92 = arith.subf %77, %91 : vector<8x128xf32>
    %cst_50 = arith.constant 9.99999974E-6 : f32
    %93 = vector.broadcast %cst_50 : f32 to vector<8x1xf32>
    %94 = arith.addf %90, %93 : vector<8x1xf32>
    %95 = math.rsqrt %94 : vector<8x1xf32>
    %96 = vector.broadcast %95 : vector<8x1xf32> to vector<8x128xf32>
    %97 = arith.mulf %92, %96 : vector<8x128xf32>
    %98 = vector.broadcast %78 : vector<1x128xf32> to vector<8x128xf32>
    %99 = arith.mulf %97, %98 : vector<8x128xf32>
    %100 = vector.broadcast %79 : vector<1x128xf32> to vector<8x128xf32>
    %101 = arith.addf %99, %100 : vector<8x128xf32>
    %c0_51 = arith.constant 0 : index
    %c0_52 = arith.constant 0 : index
    %102 = vector.load %arg15[%c0_51, %c0_52] : memref<128x256xf32, #tpu.memory_space<vmem>>, vector<128x256xf32>
    %cst_53 = arith.constant dense<0.000000e+00> : vector<8x256xf32>
    %103 = tpu.matmul %101, %102, %cst_53 {dimension_numbers = #tpu.dot_dimension_numbers<[1], [0], [0], [1], [0, 0, 1, 1], [], []>} : vector<8x128xf32>, vector<128x256xf32>, vector<8x256xf32> -> vector<8x256xf32>
    %c0_54 = arith.constant 0 : index
    %c0_55 = arith.constant 0 : index
    %104 = vector.load %arg16[%c0_54, %c0_55] : memref<1x256xf32, #tpu.memory_space<vmem>>, vector<1x256xf32>
    %105 = vector.broadcast %104 : vector<1x256xf32> to vector<8x256xf32>
    %106 = arith.addf %103, %105 : vector<8x256xf32>
    %cst_56 = arith.constant 5.000000e-01 : f32
    %107 = vector.broadcast %cst_56 : f32 to vector<8x256xf32>
    %108 = arith.mulf %107, %106 : vector<8x256xf32>
    %cst_57 = arith.constant 4.471500e-02 : f32
    %109 = vector.broadcast %cst_57 : f32 to vector<8x256xf32>
    %110 = arith.mulf %109, %106 : vector<8x256xf32>
    %111 = arith.mulf %110, %106 : vector<8x256xf32>
    %112 = arith.mulf %111, %106 : vector<8x256xf32>
    %113 = arith.addf %106, %112 : vector<8x256xf32>
    %cst_58 = arith.constant 0.797884583 : f32
    %114 = vector.broadcast %cst_58 : f32 to vector<8x256xf32>
    %115 = arith.mulf %114, %113 : vector<8x256xf32>
    %116 = math.tanh %115 : vector<8x256xf32>
    %cst_59 = arith.constant 1.000000e+00 : f32
    %117 = vector.broadcast %cst_59 : f32 to vector<8x256xf32>
    %118 = arith.addf %117, %116 : vector<8x256xf32>
    %119 = arith.mulf %108, %118 : vector<8x256xf32>
    %c0_60 = arith.constant 0 : index
    %c0_61 = arith.constant 0 : index
    %120 = vector.load %arg17[%c0_60, %c0_61] : memref<256x128xf32, #tpu.memory_space<vmem>>, vector<256x128xf32>
    %cst_62 = arith.constant dense<0.000000e+00> : vector<8x128xf32>
    %121 = tpu.matmul %119, %120, %cst_62 {dimension_numbers = #tpu.dot_dimension_numbers<[1], [0], [0], [1], [0, 0, 1, 1], [], []>} : vector<8x256xf32>, vector<256x128xf32>, vector<8x128xf32> -> vector<8x128xf32>
    %c0_63 = arith.constant 0 : index
    %c0_64 = arith.constant 0 : index
    %122 = vector.load %arg18[%c0_63, %c0_64] : memref<1x128xf32, #tpu.memory_space<vmem>>, vector<1x128xf32>
    %123 = vector.broadcast %122 : vector<1x128xf32> to vector<8x128xf32>
    %124 = arith.addf %121, %123 : vector<8x128xf32>
    %125 = arith.addf %77, %124 : vector<8x128xf32>
    %c0_65 = arith.constant 0 : index
    %c0_66 = arith.constant 0 : index
    %c0_67 = arith.constant 0 : index
    %126 = vector.load %arg19[%c0_65, %c0_66, %c0_67] : memref<1x8x128xf32, #tpu.memory_space<vmem>>, vector<1x8x128xf32>
    %127 = vector.shape_cast %126 : vector<1x8x128xf32> to vector<8x128xf32>
    %128 = vector.shape_cast %125 : vector<8x128xf32> to vector<1x8x128xf32>
    tpu.vector_store %arg19[%c0_65, %c0_66, %c0_67], %128 {strides = array<i32>} : memref<1x8x128xf32, #tpu.memory_space<vmem>>, vector<1x8x128xf32>,
    return
  }
  func.func @transform_0(%arg0: i32) -> (i32, i32, i32) {
    %c0_i32 = arith.constant 0 : i32
    %c0_i32_0 = arith.constant 0 : i32
    %c0_i32_1 = arith.constant 0 : i32
    return %arg0, %c0_i32, %c0_i32_0 : i32, i32, i32
  }
  func.func @transform_1(%arg0: i32) -> (i32, i32, i32) {
    %c0_i32 = arith.constant 0 : i32
    %c0_i32_0 = arith.constant 0 : i32
    %c0_i32_1 = arith.constant 0 : i32
    return %arg0, %c0_i32, %c0_i32_0 : i32, i32, i32
  }
  func.func @transform_2(%arg0: i32) -> (i32, i32) {
    %c0_i32 = arith.constant 0 : i32
    %c0_i32_0 = arith.constant 0 : i32
    %c0_i32_1 = arith.constant 0 : i32
    return %c0_i32, %c0_i32_0 : i32, i32
  }
  func.func @transform_3(%arg0: i32) -> (i32, i32) {
    %c0_i32 = arith.constant 0 : i32
    %c0_i32_0 = arith.constant 0 : i32
    %c0_i32_1 = arith.constant 0 : i32
    return %c0_i32, %c0_i32_0 : i32, i32
  }
  func.func @transform_4(%arg0: i32) -> (i32, i32) {
    %c0_i32 = arith.constant 0 : i32
    %c0_i32_0 = arith.constant 0 : i32
    %c0_i32_1 = arith.constant 0 : i32
    return %c0_i32, %c0_i32_0 : i32, i32
  }
  func.func @transform_5(%arg0: i32) -> (i32, i32) {
    %c0_i32 = arith.constant 0 : i32
    %c0_i32_0 = arith.constant 0 : i32
    %c0_i32_1 = arith.constant 0 : i32
    return %c0_i32, %c0_i32_0 : i32, i32
  }
  func.func @transform_6(%arg0: i32) -> (i32, i32) {
    %c0_i32 = arith.constant 0 : i32
    %c0_i32_0 = arith.constant 0 : i32
    %c0_i32_1 = arith.constant 0 : i32
    return %c0_i32, %c0_i32_0 : i32, i32
  }
  func.func @transform_7(%arg0: i32) -> (i32, i32) {
    %c0_i32 = arith.constant 0 : i32
    %c0_i32_0 = arith.constant 0 : i32
    %c0_i32_1 = arith.constant 0 : i32
    return %c0_i32, %c0_i32_0 : i32, i32
  }
  func.func @transform_8(%arg0: i32) -> (i32, i32, i32) {
    %c0_i32 = arith.constant 0 : i32
    %c0_i32_0 = arith.constant 0 : i32
    %c0_i32_1 = arith.constant 0 : i32
    %c0_i32_2 = arith.constant 0 : i32
    return %c0_i32, %c0_i32_0, %c0_i32_1 : i32, i32, i32
  }
  func.func @transform_9(%arg0: i32) -> (i32, i32) {
    %c0_i32 = arith.constant 0 : i32
    %c0_i32_0 = arith.constant 0 : i32
    %c0_i32_1 = arith.constant 0 : i32
    return %c0_i32, %c0_i32_0 : i32, i32
  }
  func.func @transform_10(%arg0: i32) -> (i32, i32) {
    %c0_i32 = arith.constant 0 : i32
    %c0_i32_0 = arith.constant 0 : i32
    %c0_i32_1 = arith.constant 0 : i32
    return %c0_i32, %c0_i32_0 : i32, i32
  }
  func.func @transform_11(%arg0: i32) -> (i32, i32) {
    %c0_i32 = arith.constant 0 : i32
    %c0_i32_0 = arith.constant 0 : i32
    %c0_i32_1 = arith.constant 0 : i32
    return %c0_i32, %c0_i32_0 : i32, i32
  }
  func.func @transform_12(%arg0: i32) -> (i32, i32) {
    %c0_i32 = arith.constant 0 : i32
    %c0_i32_0 = arith.constant 0 : i32
    %c0_i32_1 = arith.constant 0 : i32
    return %c0_i32, %c0_i32_0 : i32, i32
  }
  func.func @transform_13(%arg0: i32) -> (i32, i32) {
    %c0_i32 = arith.constant 0 : i32
    %c0_i32_0 = arith.constant 0 : i32
    %c0_i32_1 = arith.constant 0 : i32
    return %c0_i32, %c0_i32_0 : i32, i32
  }
  func.func @transform_14(%arg0: i32) -> (i32, i32) {
    %c0_i32 = arith.constant 0 : i32
    %c0_i32_0 = arith.constant 0 : i32
    %c0_i32_1 = arith.constant 0 : i32
    return %c0_i32, %c0_i32_0 : i32, i32
  }
  func.func @transform_15(%arg0: i32) -> (i32, i32) {
    %c0_i32 = arith.constant 0 : i32
    %c0_i32_0 = arith.constant 0 : i32
    %c0_i32_1 = arith.constant 0 : i32
    return %c0_i32, %c0_i32_0 : i32, i32
  }
  func.func @transform_16(%arg0: i32) -> (i32, i32) {
    %c0_i32 = arith.constant 0 : i32
    %c0_i32_0 = arith.constant 0 : i32
    %c0_i32_1 = arith.constant 0 : i32
    return %c0_i32, %c0_i32_0 : i32, i32
  }
  func.func @transform_17(%arg0: i32) -> (i32, i32) {
    %c0_i32 = arith.constant 0 : i32
    %c0_i32_0 = arith.constant 0 : i32
    %c0_i32_1 = arith.constant 0 : i32
    return %c0_i32, %c0_i32_0 : i32, i32
  }
  func.func @transform_18(%arg0: i32) -> (i32, i32, i32) {
    %c0_i32 = arith.constant 0 : i32
    %c0_i32_0 = arith.constant 0 : i32
    %c0_i32_1 = arith.constant 0 : i32
    return %arg0, %c0_i32, %c0_i32_0 : i32, i32, i32
  }
}

</mosaic_0001>

<bundles_post_ra>
// kernel: tpu_custom_call.1
= control target key start
LH: loop header
LB: loop body
LE: loop exit
PB: predicated region body
PF: predicated region fallthrough
CT: control target
= control target key end

     0   :  { %s4587_s0 = inlined_call_operand.hbm [shape: f32[2,8,128], index: 0, kind: input, shape index: {}]   ;;  %s4588_s1 = inlined_call_operand.hbm [shape: s32[2,8,8], index: 1, kind: input, shape index: {}]   ;;  %s4589_s2 = inlined_call_operand.hbm [shape: f32[128,128], index: 2, kind: input, shape index: {}]   ;;  %s4590_s3 = inlined_call_operand.vmem [shape: f32[1,128], index: 3, kind: input, shape index: {}]   ;;  %s4591_s4 = inlined_call_operand.hbm [shape: f32[128,128], index: 4, kind: input, shape index: {}]   ;;  %s4592_s5 = inlined_call_operand.vmem [shape: f32[1,128], index: 5, kind: input, shape index: {}]   ;;  %s4593_s6 = inlined_call_operand.hbm [shape: f32[128,128], index: 6, kind: input, shape index: {}]   ;;  %s4594_s7 = inlined_call_operand.vmem [shape: f32[1,128], index: 7, kind: input, shape index: {}]   ;;  %s4595_s8 = inlined_call_operand.hbm [shape: f32[4,32,128], index: 8, kind: input, shape index: {}]   ;;  %s4596_s9 = inlined_call_operand.vmem [shape: f32[1,128], index: 9, kind: input, shape index: {}]   ;;  %s4597_s10 = inlined_call_operand.vmem [shape: f32[1,128], index: 10, kind: input, shape index: {}]   ;;  %s4598_s11 = inlined_call_operand.vmem [shape: f32[1,128], index: 11, kind: input, shape index: {}]   ;;  %s4599_s12 = inlined_call_operand.vmem [shape: f32[1,128], index: 12, kind: input, shape index: {}]   ;;  %s4600_s13 = inlined_call_operand.vmem [shape: f32[1,128], index: 13, kind: input, shape index: {}]   ;;  %s4601_s14 = inlined_call_operand.hbm [shape: f32[128,256], index: 14, kind: input, shape index: {}]   ;;  %s4602_s15 = inlined_call_operand.vmem [shape: f32[1,256], index: 15, kind: input, shape index: {}]   ;;  %s4603_s16 = inlined_call_operand.hbm [shape: f32[256,128], index: 16, kind: input, shape index: {}]   ;;  %s4604_s17 = inlined_call_operand.vmem [shape: f32[1,128], index: 17, kind: input, shape index: {}]   ;;  %s4605_s18 = inlined_call_operand.hbm [shape: f32[2,8,128], index: 18, kind: output, shape index: {}]  }
   0x1   :  { %4616 = sst [smem:[#allocation25_spill]] %s4587_s0 }
   0x2   :  { %4617 = sst [smem:[#allocation26_spill]] %s4588_s1 }
   0x3   :  { %4618 = sst [smem:[#allocation27_spill]] %s4589_s2 }
   0x4   :  { %4619 = sst [smem:[#allocation28_spill]] %s4590_s3 }
   0x5   :  { %4620 = sst [smem:[#allocation29_spill]] %s4591_s4 }
   0x6   :  { %4621 = sst [smem:[#allocation30_spill]] %s4593_s6 }
   0x7   :  { %4622 = sst [smem:[#allocation31_spill]] %s4594_s7 }
   0x8   :  { %4623 = sst [smem:[#allocation32_spill]] %s4595_s8 }
   0x9   :  { %4624 = sst [smem:[#allocation33_spill]] %s4596_s9 }
   0xa   :  { %4625 = sst [smem:[#allocation34_spill]] %s4599_s12 }
   0xb   :  { %4626 = sst [smem:[#allocation35_spill]] %s4600_s13 }
   0xc   :  { %4627 = sst [smem:[#allocation36_spill]] %s4601_s14 }
   0xd   :  { %4628 = sst [smem:[#allocation37_spill]] %s4602_s15 }
   0xe   :  { %4629 = sst [smem:[#allocation38_spill]] %s4603_s16 }
   0xf   :  { %4630 = sst [smem:[#allocation39_spill]] %s4604_s17 }
  0x10   :  { %4631 = sst [smem:[#allocation40_spill]] %s4605_s18 }
  0x11   :  { %23 = vsyncpa [#allocation3], 0 }
  0x12   :  { %25 = vsyncpa [#allocation3 + $0x1], 0 }
  0x13   :  { %26 = vsyncpa [#allocation6], 0 }
  0x14   :  { %28 = vsyncpa [#allocation6 + $0x1], 0 }
  0x15   :  { %29 = vsyncpa [#allocation9], 0 }
  0x16   :  { %30 = vsyncpa [#allocation12], 0 }
  0x17   :  { %31 = vsyncpa [#allocation15], 0 }
  0x18   :  { %32 = vsyncpa [#allocation4], 0 }
  0x19   :  { %34 = vsyncpa [#allocation4 + $0x1], 0  ;;  %s3978_s27 = smov 0   ;;  %s3980_s28 = smov 0  }
  0x1a   :  { %s3982_s29 = smov 0   ;;  %s3984_s30 = smov 0  }
  0x1b LB: > { %s3862_s0 = smov [#allocation7]   ;;  %s3999_s1 = sadd.s32 4294967295, %s3860_s30   ;;  %s3860_s30 = sphi %s3984_s30, %s4676_s30   ;;  %s3856_s29 = sphi %s3982_s29, %s4675_s29   ;;  %s3852_s28 = sphi %s3980_s28, %s4674_s28   ;;  %s3848_s27 = sphi %s3978_s27, %s4673_s27  }
  0x1c   : > { %s471_s19 = sshll.u32 %s3862_s0, 4  ;;  %p2870_p0 = scmp.ge.s32.totalorder %s3860_s30, 1  ;;  %s4004_s19 = int_to_ptr.vmem [resolvable:$true] %s471_s19 }
  0x1d   : > { %p4611_p1 = scmp.eq.s32.totalorder %s3999_s1, 0  ;;  %p459_p2 = scmp.lt.s32.totalorder %s3860_s30, 3 }
  0x1e   : > { %s3863_s21 = smov [#allocation8]   ;;  %s3864_s23 = smov [#allocation11]  }
  0x1f   : > { %p4006_p3 = pnand %p2870_p0, %p459_p2  ;;  %s487_s22 = sshll.u32 %s3863_s21, 4  ;;  %s4019_s22 = int_to_ptr.vmem [resolvable:$true] %s487_s22 }
  0x20   : > { %s519_s24 = sshll.u32 %s3864_s23, 4  ;;  %s4634_s0 = sld [smem:[#allocation27_spill]]  ;;  %s4021_s24 = int_to_ptr.vmem [resolvable:$true] %s519_s24 }
  0x21   : > { %s4632_s20 = scalar_select %p4006_p3, 1, 0 }
  0x22   : > { %p3428_p5 = pneg %p4006_p3 }
  0x24   : > { %p4015_p6 = pnand %p3428_p5, %p4611_p1 }
  0x26   : > { %s3546_s18 = scalar_lea.hbm %s4634_s0, 2048  ;;  %p4031_p8 = pneg %p4015_p6 }
  0x27   : > { %p3547_p7 = scmp.ne.s32.totalorder %s4634_s0, %s3546_s18  ;;  %p3553_p11 = scmp.lt.u32.totalorder %s3546_s18, %s4634_s0 }
  0x29   : > { %p3549_p9 = pnand %p4031_p8, %p3547_p7 }
  0x2b   : > { %p3550_p10 = pneg %p3549_p9 }
  0x2d   : > { %p3555_p12 = pnand %p3553_p11, %p3550_p10 }
  0x2f   : > { %3558 = shalt.err (!%p3555_p12)
}
  0x30   : > { %s3559_s15 = scalar_lea.vmem %s4004_s19, 2048  ;;  %p3567_p5 = scmp.lt.s32.totalorder %s4004_s19, %s4004_s19 }
  0x31   : > { %p3560_p13 = scmp.ne.s32.totalorder %s4004_s19, %s3559_s15  ;;  %p3568_p4 = scmp.lt.s32.totalorder %s3559_s15, %s3559_s15 }
  0x33   : > { %p3562_p0 = pnand %p3560_p13, %p4031_p8  ;;  %p3569_p7 = por %p3568_p4, %p3567_p5 }
  0x35   : > { %p3563_p2 = pneg %p3562_p0 }
  0x37   : > { %p3570_p9 = pnand %p3569_p7, %p3563_p2 }
  0x39   : > { %3573 = shalt.err (!%p3570_p9)
}
  0x3a   : > { %s4613_s17 = smov 128   ;;  %s3866_s13 = smov 8  }
  0x3b   : > { %3431 = dma.hbm_to_vmem [thread:$0]  (!%p4015_p6), %s4634_s0, 2048, %s4004_s19, [#allocation6], %s4613_s17, %s4613_s17, %s3866_s13  }
  0x3c   : > { %s4636_s4 = sld [smem:[#allocation29_spill]] }
  0x42   : > { %s3574_s15 = scalar_lea.hbm %s4636_s4, 2048 }
  0x43   : > { %p3575_p4 = scmp.ne.s32.totalorder %s4636_s4, %s3574_s15  ;;  %p3581_p12 = scmp.lt.u32.totalorder %s3574_s15, %s4636_s4 }
  0x45   : > { %p3577_p10 = pnand %p3575_p4, %p4031_p8 }
  0x47   : > { %p3578_p11 = pneg %p3577_p10 }
  0x49   : > { %p3583_p13 = pnand %p3581_p12, %p3578_p11 }
  0x4b   : > { %3586 = shalt.err (!%p3583_p13)
}
  0x4c   : > { %s3587_s19 = scalar_lea.vmem %s4019_s22, 2048  ;;  %p3595_p7 = scmp.lt.s32.totalorder %s4019_s22, %s4019_s22 }
  0x4d   : > { %p3588_p0 = scmp.ne.s32.totalorder %s4019_s22, %s3587_s19  ;;  %p3596_p9 = scmp.lt.s32.totalorder %s3587_s19, %s3587_s19 }
  0x4f   : > { %p3590_p2 = pnand %p3588_p0, %p4031_p8  ;;  %p3597_p4 = por %p3596_p9, %p3595_p7 }
  0x51   : > { %p3591_p5 = pneg %p3590_p2 }
  0x53   : > { %p3598_p10 = pnand %p3597_p4, %p3591_p5 }
  0x55   : > { %3601 = shalt.err (!%p3598_p10)
}
  0x56   : > { %3434 = dma.hbm_to_vmem [thread:$0]  (!%p4015_p6), %s4636_s4, 2048, %s4019_s22, [#allocation9], %s4613_s17, %s4613_s17, %s3866_s13  }
  0x57   : > { %s4637_s8 = sld [smem:[#allocation32_spill]] }
  0x5d   : > { %s3602_s18 = scalar_lea.hbm %s4637_s8, 2048 }
  0x5e   : > { %p3603_p11 = scmp.ne.s32.totalorder %s4637_s8, %s3602_s18  ;;  %p3609_p0 = scmp.lt.u32.totalorder %s3602_s18, %s4637_s8 }
  0x60   : > { %p3605_p12 = pnand %p3603_p11, %p4031_p8 }
  0x62   : > { %p3606_p13 = pneg %p3605_p12 }
  0x64   : > { %p3611_p2 = pnand %p3609_p0, %p3606_p13 }
  0x66   : > { %3614 = shalt.err (!%p3611_p2)
}
  0x67   : > { %s3615_s22 = scalar_lea.vmem %s4021_s24, 2048  ;;  %p3623_p4 = scmp.lt.s32.totalorder %s4021_s24, %s4021_s24 }
  0x68   : > { %p3616_p5 = scmp.ne.s32.totalorder %s4021_s24, %s3615_s22  ;;  %p3624_p10 = scmp.lt.s32.totalorder %s3615_s22, %s3615_s22 }
  0x6a   : > { %p3618_p7 = pnand %p3616_p5, %p4031_p8  ;;  %p3625_p11 = por %p3624_p10, %p3623_p4 }
  0x6c   : > { %p3619_p9 = pneg %p3618_p7 }
  0x6e   : > { %p3626_p12 = pnand %p3625_p11, %p3619_p9 }
  0x70   : > { %3629 = shalt.err (!%p3626_p12)
}
  0x71   : > { %3440 = dma.hbm_to_vmem [thread:$0]  (!%p4015_p6), %s4637_s8, 2048, %s4021_s24, [#allocation12], %s4613_s17, %s4613_s17, %s3866_s13  }
  0x72   : > { %s3867_s7 = smov [#allocation10]   ;;  %s3868_s12 = smov [#allocation13]  }
  0x73   : > { %s503_s9 = sshll.u32 %s3867_s7, 4  ;;  %s547_s18 = sshll.u32 %s3868_s12, 4  ;;  %s504_s9 = int_to_ptr.vmem [resolvable:$true] %s503_s9  ;;  %s548_s18 = int_to_ptr.vmem [resolvable:$true] %s547_s18 }
  0x74   : > { %s4638_s6 = sld [smem:[#allocation30_spill]] }
  0x7a   : > { %s3630_s23 = scalar_lea.hbm %s4638_s6, 2048 }
  0x7b   : > { %p3631_p13 = scmp.ne.s32.totalorder %s4638_s6, %s3630_s23  ;;  %p3637_p5 = scmp.lt.u32.totalorder %s3630_s23, %s4638_s6 }
  0x7d   : > { %p3633_p0 = pnand %p3631_p13, %p4031_p8 }
  0x7f   : > { %p3634_p2 = pneg %p3633_p0 }
  0x81   : > { %p3639_p7 = pnand %p3637_p5, %p3634_p2 }
  0x83   : > { %3642 = shalt.err (!%p3639_p7)
}
  0x84   : > { %s3643_s24 = scalar_lea.vmem %s504_s9, 2048  ;;  %p3651_p11 = scmp.lt.s32.totalorder %s504_s9, %s504_s9 }
  0x85   : > { %p3644_p9 = scmp.ne.s32.totalorder %s504_s9, %s3643_s24  ;;  %p3652_p12 = scmp.lt.s32.totalorder %s3643_s24, %s3643_s24 }
  0x87   : > { %p3646_p4 = pnand %p3644_p9, %p4031_p8  ;;  %p3653_p1 = por %p3652_p12, %p3651_p11 }
  0x89   : > { %p3647_p10 = pneg %p3646_p4 }
  0x8b   : > { %p3654_p3 = pnand %p3653_p1, %p3647_p10 }
  0x8d   : > { %3657 = shalt.err (!%p3654_p3)
}
  0x8e   : > { %3437 = dma.hbm_to_vmem [thread:$0]  (!%p4015_p6), %s4638_s6, 2048, %s504_s9, [#allocation9], %s4613_s17, %s4613_s17, %s3866_s13  }
  0x8f   : > { %s4639_s14 = sld [smem:[#allocation36_spill]] }
  0x95   : > { %s3658_s25 = scalar_lea.hbm %s4639_s14, 4096 }
  0x96   : > { %p3659_p1 = scmp.ne.s32.totalorder %s4639_s14, %s3658_s25  ;;  %p3665_p0 = scmp.lt.u32.totalorder %s3658_s25, %s4639_s14 }
  0x98   : > { %p3661_p3 = pnand %p3659_p1, %p4031_p8 }
  0x9a   : > { %p3662_p13 = pneg %p3661_p3 }
  0x9c   : > { %p3667_p2 = pnand %p3665_p0, %p3662_p13 }
  0x9e   : > { %3670 = shalt.err (!%p3667_p2)
}
  0x9f   : > { %s3671_s19 = scalar_lea.vmem %s548_s18, 4096  ;;  %p3679_p4 = scmp.lt.s32.totalorder %s548_s18, %s548_s18 }
  0xa0   : > { %p3672_p5 = scmp.ne.s32.totalorder %s548_s18, %s3671_s19  ;;  %p3680_p10 = scmp.lt.s32.totalorder %s3671_s19, %s3671_s19 }
  0xa2   : > { %p3674_p7 = pnand %p3672_p5, %p4031_p8  ;;  %p3681_p11 = por %p3680_p10, %p3679_p4 }
  0xa4   : > { %p3675_p9 = pneg %p3674_p7 }
  0xa6   : > { %p3682_p12 = pnand %p3681_p11, %p3675_p9 }
  0xa8   : > { %3685 = shalt.err (!%p3682_p12)
}
  0xa9   : > { %s3869_s9 = smov 256   ;;  %s3870_s24 = smov 16  }
  0xaa   : > { %3443 = dma.hbm_to_vmem [thread:$0]  (!%p4015_p6), %s4639_s14, 4096, %s548_s18, [#allocation12], %s3869_s9, %s3869_s9, %s3870_s24  }
  0xab   : > { %s3871_s7 = smov [#allocation14]   ;;  %s4640_s16 = sld [smem:[#allocation38_spill]] }
  0xac   : > { %s563_s12 = sshll.u32 %s3871_s7, 4  ;;  %s564_s12 = int_to_ptr.vmem [resolvable:$true] %s563_s12 }
  0xb1   : > { %s3686_s23 = scalar_lea.hbm %s4640_s16, 4096 }
  0xb2   : > { %p3687_p1 = scmp.ne.s32.totalorder %s4640_s16, %s3686_s23  ;;  %p3693_p0 = scmp.lt.u32.totalorder %s3686_s23, %s4640_s16 }
  0xb4   : > { %p3689_p3 = pnand %p3687_p1, %p4031_p8 }
  0xb6   : > { %p3690_p13 = pneg %p3689_p3 }
  0xb8   : > { %p3695_p2 = pnand %p3693_p0, %p3690_p13 }
  0xba   : > { %3698 = shalt.err (!%p3695_p2)
}
  0xbb   : > { %s3699_s18 = scalar_lea.vmem %s564_s12, 4096  ;;  %p3707_p4 = scmp.lt.s32.totalorder %s564_s12, %s564_s12 }
  0xbc   : > { %p3700_p5 = scmp.ne.s32.totalorder %s564_s12, %s3699_s18  ;;  %p3708_p10 = scmp.lt.s32.totalorder %s3699_s18, %s3699_s18 }
  0xbe   : > { %p3702_p7 = pnand %p3700_p5, %p4031_p8  ;;  %p3709_p11 = por %p3708_p10, %p3707_p4 }
  0xc0   : > { %p3703_p9 = pneg %p3702_p7 }
  0xc2   : > { %p3710_p12 = pnand %p3709_p11, %p3703_p9 }
  0xc4   : > { %3713 = shalt.err (!%p3710_p12)
}
  0xc5   : > { %s4641_s9 = smov 128   ;;  %s2869_s2 = sadd.s32 4294967294, %s3860_s30  }
  0xc6   : > { %3446 = dma.hbm_to_vmem [thread:$0]  (!%p4015_p6), %s4640_s16, 4096, %s564_s12, [#allocation15], %s4641_s9, %s4641_s9, %s3866_s13  }
  0xc7   : > { %s4169_s21 = sadd.s32 1, %s3860_s30   ;;  %s47_s3 = sadd.s32 1, %s3856_s29 }
  0xc8   : > { %s44_s0 = ssub.s32 %s3860_s30, %s4169_s21  ;;  %p54_p1 = scmp.ne.s32.totalorder %s3856_s29, %s3852_s28 }
  0xc9   : > { %p45_p8 = scmp.eq.s32.totalorder %s44_s0, 0  ;;  %p55_p3 = scmp.eq.s32.totalorder %s3860_s30, 0 }
  0xca   : > { %p60_p13 = scmp.ne.s32.totalorder %s3852_s28, %s3848_s27  ;;  %p4644_p2 = scmp.eq.s32.totalorder %s3999_s1, 0 }
  0xcb   : > { %s4180_s7 = scalar_select %p45_p8, %s3856_s29, %s47_s3  }
  0xcc   : > { %p4182_p0 = por %p55_p3, %p54_p1  ;;  %p4188_p6 = por %p4644_p2, %p60_p13 }
  0xcd   : > { %4642 = sst [smem:[#allocation24_spill]] %s4180_s7  ;;  %p446_p5 = scmp.eq.s32.totalorder %s3999_s1, 1 }
  0xce   : > { %s4645_s13 = scalar_select %p4188_p6, 1, 0 }
  0xcf   : > { %p452_p7 = scmp.eq.s32.totalorder %s2869_s2, 1  ;;  %p3464_p9 = scmp.lt.s32.totalorder %s3860_s30, 2 }
  0xd0   : > { %s580_s12 = sand.u32 1, %s3856_s29   ;;  %p4195_p4 = por %p446_p5, %p54_p1 }
  0xd1   : > { %p4199_p10 = por %p452_p7, %p60_p13  ;;  %s4203_s15 = sshll.u32 %s580_s12, 3 }
  0xd2   : > { %s4646_s26 = scalar_select %p4195_p4, 1, 0 }
  0xd3   : > { %s4647_s23 = scalar_select %p4199_p10, 1, 0 }
  0xd4   : > { %s2879_s22 = sshll.u32 %s3860_s30, 7  ;;  %s4648_s9 = sld [smem:[#allocation25_spill]] }
  0xd5   : > { %s584_s24 = scalar_lea.vmem [#allocation2], %s4203_s15  ;;  %p4216_p11 = pnand %p3464_p9, %p4182_p0 }
  0xd6   : > { %s591_s2 = sshll.u32 %s584_s24, 4  ;;  %s4650_s6 = sld [smem:[#allocation26_spill]]  ;;  %s4212_s2 = int_to_ptr.vmem [resolvable:$true] %s591_s2 }
  0xd7   : > { %s598_s18 = sand.u32 1, %s3860_s30   ;;  %s581_s8 = scalar_lea.sflag [#allocation3], %s580_s12 }
  0xd8   : > { %p3716_p8 = pneg %p4216_p11 }
  0xda   : > { %s4209_s17 = scalar_lea.hbm %s4648_s9, %s2879_s22  ;;  %s3719_s16 = scalar_lea.hbm %s4648_s9, 256 }
  0xdb   : > { %s3714_s14 = scalar_lea.hbm %s4209_s17, 128  ;;  %p3720_p13 = scmp.lt.u32.totalorder %s4209_s17, %s4648_s9 }
  0xdc   : > { %s4223_s19 = scalar_lea.hbm %s4650_s6, %s2879_s22  ;;  %p3715_p12 = scmp.ne.s32.totalorder %s4209_s17, %s3714_s14 }
  0xdd   : > { %p3721_p0 = scmp.lt.u32.totalorder %s3719_s16, %s3714_s14  ;;  %p3723_p5 = scmp.lt.u32.totalorder %s3714_s14, %s4209_s17 }
  0xde   : > { %p3717_p1 = pnand %p3716_p8, %p3715_p12 }
  0xdf   : > { %p3722_p2 = por %p3721_p0, %p3720_p13 }
  0xe0   : > { %p3718_p3 = pneg %p3717_p1 }
  0xe1   : > { %p3724_p7 = por %p3723_p5, %p3722_p2 }
  0xe3   : > { %p3725_p9 = pnand %p3724_p7, %p3718_p3 }
  0xe5   : > { %3728 = shalt.err (!%p3725_p9)
}
  0xe6   : > { %s3729_s12 = scalar_lea.vmem %s4212_s2, 128  ;;  %s3872_s22 = smov [#allocation2]  }
  0xe7   : > { %p3730_p12 = scmp.ne.s32.totalorder %s4212_s2, %s3729_s12  ;;  %s3734_s3 = sshll.u32 %s3872_s22, 4  ;;  %s3735_s3 = int_to_ptr.vmem [resolvable:$false] %s3734_s3 }
  0xe8   : > { %s3736_s7 = scalar_lea.vmem %s3735_s3, 256  ;;  %p3737_p4 = scmp.lt.s32.totalorder %s4212_s2, %s3735_s3 }
  0xe9   : > { %p3732_p1 = pnand %p3730_p12, %p3716_p8  ;;  %p3738_p13 = scmp.lt.s32.totalorder %s3736_s7, %s3729_s12 }
  0xeb   : > { %p3733_p10 = pneg %p3732_p1  ;;  %p3739_p0 = por %p3738_p13, %p3737_p4 }
  0xed   : > { %p3740_p2 = pnand %p3739_p0, %p3733_p10 }
  0xef   : > { %3743 = shalt.err (!%p3740_p2)
}
  0xf0   : > { %3450 = dma.hbm_to_vmem [thread:$0]  (!%p4216_p11), %s4209_s17, 128, %s4212_s2, %s581_s8  }
  0xf1   : > { %s602_s14 = scalar_lea.vmem [#allocation5], %s4203_s15  ;;  %s599_s25 = scalar_lea.sflag [#allocation6], %s598_s18 }
  0xf2   : > { %s609_s16 = sshll.u32 %s602_s14, 4  ;;  %s3744_s24 = scalar_lea.hbm %s4223_s19, 128  ;;  %s610_s16 = int_to_ptr.vmem [resolvable:$true] %s609_s16 }
  0xf3   : > { %p3745_p4 = scmp.ne.s32.totalorder %s4223_s19, %s3744_s24  ;;  %s3749_s22 = scalar_lea.hbm %s4650_s6, 256 }
  0xf4   : > { %p3750_p5 = scmp.lt.u32.totalorder %s4223_s19, %s4650_s6  ;;  %p3751_p7 = scmp.lt.u32.totalorder %s3749_s22, %s3744_s24 }
  0xf5   : > { %p3747_p10 = pnand %p3745_p4, %p3716_p8  ;;  %p3753_p12 = scmp.lt.u32.totalorder %s3744_s24, %s4223_s19 }
  0xf6   : > { %p3752_p9 = por %p3751_p7, %p3750_p5 }
  0xf7   : > { %p3748_p3 = pneg %p3747_p10 }
  0xf8   : > { %p3754_p1 = por %p3753_p12, %p3752_p9 }
  0xfa   : > { %p3755_p13 = pnand %p3754_p1, %p3748_p3 }
  0xfc   : > { %3758 = shalt.err (!%p3755_p13)
}
  0xfd   : > { %s3759_s8 = scalar_lea.vmem %s610_s16, 128  ;;  %s3873_s15 = smov [#allocation5]  }
  0xfe   : > { %p3760_p0 = scmp.ne.s32.totalorder %s610_s16, %s3759_s8  ;;  %s3764_s17 = sshll.u32 %s3873_s15, 4  ;;  %s3765_s17 = int_to_ptr.vmem [resolvable:$false] %s3764_s17 }
  0xff   : > { %s3766_s2 = scalar_lea.vmem %s3765_s17, 256  ;;  %p3767_p10 = scmp.lt.s32.totalorder %s610_s16, %s3765_s17 }
 0x100   : > { %p3762_p2 = pnand %p3760_p0, %p3716_p8  ;;  %p3768_p6 = scmp.lt.s32.totalorder %s3766_s2, %s3759_s8 }
 0x102   : > { %p3763_p4 = pneg %p3762_p2  ;;  %p3769_p5 = por %p3768_p6, %p3767_p10 }
 0x104   : > { %p3770_p7 = pnand %p3769_p5, %p3763_p4 }
 0x106   : > { %3773 = shalt.err (!%p3770_p7)
}
 0x107   : > { %3453 = dma.hbm_to_vmem [thread:$0]  (!%p4216_p11), %s4223_s19, 128, %s610_s16, %s599_s25  }
 0x108   : > { %p4651_p3 = scmp.ne.s32.totalorder %s4632_s20, 0 }
 0x109   : > { %s4276_s18 = sand.u32 (!%p4651_p3), 1, %s3852_s28   ;;  %p4652_p6 = scmp.ne.s32.totalorder (!%p4651_p3), %s4645_s13, 0 }
 0x10a   : > { %618 = sbr.rel (%p4651_p3) target bundleno = 2768 (0xad0), region = 92  ;;  %s4279_s14 = sshll.u32 (!%p4651_p3), %s4276_s18, 3 }
 0x10b   : > { %s621_s24 = scalar_lea.sflag (!%p4651_p3), [#allocation3], %s4276_s18  ;;  %s624_s4 = scalar_lea.vmem (!%p4651_p3), [#allocation2], %s4279_s14 }
 0x111   : > { %3819 = dma.done.wait (%p4652_p6), %s621_s24, 128  }
 0x112   : > { %3821 = vsyncadd (%p4652_p6), %s621_s24, 4294967168  ;;  %s629_s20 = sand.u32 1, %s3999_s1   ;;  %s633_s19 = scalar_lea.vmem [#allocation5], %s4279_s14 }
 0x113   : > { %s630_s0 = scalar_lea.sflag [#allocation6], %s629_s20 }
 0x114   : > { %3823 = dma.done.wait (%p4652_p6), %s630_s0, 128  }
 0x115   : > { %3825 = vsyncadd (%p4652_p6), %s630_s0, 4294967168  ;;  %p4653_p11 = scmp.eq.s32.totalorder %s3999_s1, 0 }
 0x117   : > { %3827 = dma.done.wait (%p4653_p11), [#allocation6], 2048   ;;  %p4654_p8 = pmov %p4653_p11 }
 0x119   : > { %3829 = vsyncadd (%p4654_p8), [#allocation6], 4294965248  ;;  %p4655_p9 = pmov %p4654_p8 }
 0x11a   : > { %p4656_p12 = pmov %p4654_p8 }
 0x11b   : > { %3831 = dma.done.wait (%p4655_p9), [#allocation9], 4096  }
 0x11c   : > { %3833 = vsyncadd (%p4656_p12), [#allocation9], 4294963200  ;;  %p4657_p1 = pmov %p4654_p8 }
 0x11e   : > { %3835 = dma.done.wait (%p4657_p1), [#allocation12], 6144   ;;  %p4658_p13 = pmov %p4657_p1 }
 0x11f   : > { %p4659_p0 = pmov %p4657_p1 }
 0x120   : > { %3837 = vsyncadd (%p4658_p13), [#allocation12], 4294961152 }
 0x121   : > { %3839 = dma.done.wait (%p4659_p0), [#allocation15], 4096   ;;  %p4660_p2 = pmov %p4659_p0 }
 0x122   : > { %v4309_v0 = vld [vmem:[%s624_s4] sm:$0xff]  ;;  %v3874_v4 = vmov 0.0|0.0   ;;  %v749_v7 = vld [vmem:[#allocation7 + $0x10] sm:$0xff]  ;;  %v750_v8 = vld [vmem:[#allocation7 + $0x18] sm:$0xff]  ;;  %vm3875_vm0 = vmmov 0   ;;  %v3876_v41 = vmov 0.0  }
 0x123   : > { %3841 = vsyncadd (%p4660_p2), [#allocation15], 4294963200  ;;  %721 = vadd.xlane.f32.xlu0 %v4309_v0  ;;  %v747_v1 = vld [vmem:[#allocation7] sm:$0xff]  ;;  %v748_v2 = vld [vmem:[#allocation7 + $0x8] sm:$0xff]  ;;  %3238 = vmatprep.subr.bf16.mxu0 %v3874_v4  ;;  %v3242_v12 = vpack.c.bf16 %v750_v8, %v749_v7  ;;  %s3877_s7 = smov 32   ;;  %s3878_s8 = smov 96  }
 0x124   : > { %v840_v3 = vld [vmem:[#allocation8] sm:$0xff]  ;;  %v3239_v5 = vpack.c.bf16 %v748_v2, %v747_v1  ;;  %3262 = vmatprep.subr.bf16.mxu1 %v3874_v4  ;;  %v841_v6 = vld [vmem:[#allocation8 + $0x8] sm:$0xff]  ;;  %v842_v10 = vld [vmem:[#allocation8 + $0x10] sm:$0xff]  ;;  %3081 = vmatprep.mubr.msk.f32.mxu0 %vm3875_vm0, %v3876_v41  ;;  %s4661_s2 = sld [smem:[#allocation28_spill]]  ;;  %s3879_s24 = smov 64   ;;  %vm1464_vm1 = vcmask 261120  }
 0x125   : > { %v3263_v9 = vpack.c.bf16 %v841_v6, %v840_v3  ;;  %v843_v11 = vld [vmem:[#allocation8 + $0x18] sm:$0xff]  ;;  %v751_v14 = vld [vmem:[#allocation7 + $0x20] sm:$0xff]  ;;  %v752_v15 = vld [vmem:[#allocation7 + $0x28] sm:$0xff]  ;;  %3116 = vmatprep.mubr.msk.f32.mxu1 %vm3875_vm0, %v3876_v41  ;;  %vm1777_vm3 = vcmask 64512   ;;  %s4662_s0 = sld [smem:[#allocation31_spill]]  ;;  %s4663_s16 = sld [smem:[#allocation33_spill]] }
 0x126   : > { %3240 = vmatpush3.bf16.msra.mxu0 %v3239_v5  ;;  %v3266_v13 = vpack.c.bf16 %v843_v11, %v842_v10  ;;  %v844_v16 = vld [vmem:[#allocation8 + $0x20] sm:$0xff]  ;;  %v845_v17 = vld [vmem:[#allocation8 + $0x28] sm:$0xff]  ;;  %v3245_v18 = vpack.c.bf16 %v752_v15, %v751_v14  ;;  %v753_v24 = vld [vmem:[#allocation7 + $0x30] sm:$0xff]  ;;  %s4664_s22 = sld [smem:[#allocation34_spill]]  ;;  %s4667_s20 = sld [smem:[#allocation39_spill]] }
 0x127   : > { %3264 = vmatpush3.bf16.msra.mxu1 %v3263_v9  ;;  %3241 = vmatprep.subr.bf16.mxu0 %v3874_v4  ;;  %v3269_v19 = vpack.c.bf16 %v845_v17, %v844_v16  ;;  %v754_v25 = vld [vmem:[#allocation7 + $0x38] sm:$0xff]  ;;  %v846_v27 = vld [vmem:[#allocation8 + $0x30] sm:$0xff]  ;;  %v755_v30 = vld [vmem:[#allocation7 + $0x40] sm:$0xff]  ;;  %s4668_s12 = sld [smem:[#allocation40_spill]]  ;;  %s2706_s3 = scalar_lea.sflag [#allocation4], %s4276_s18 }
 0x128   : > { %3265 = vmatprep.subr.bf16.mxu1 %v3874_v4  ;;  %v3248_v26 = vpack.c.bf16 %v754_v25, %v753_v24  ;;  %v847_v28 = vld [vmem:[#allocation8 + $0x38] sm:$0xff]  ;;  %v756_v31 = vld [vmem:[#allocation7 + $0x48] sm:$0xff]  ;;  %v848_v33 = vld [vmem:[#allocation8 + $0x40] sm:$0xff]  ;;  %p4669_p10 = scmp.ne.s32.totalorder %s4646_s26, 0 }
 0x129   : > { %v3272_v29 = vpack.c.bf16 %v847_v28, %v846_v27  ;;  %v3251_v32 = vpack.c.bf16 %v756_v31, %v755_v30  ;;  %v849_v34 = vld [vmem:[#allocation8 + $0x48] sm:$0xff]  ;;  %v757_v36 = vld [vmem:[#allocation7 + $0x50] sm:$0xff]  ;;  %v758_v37 = vld [vmem:[#allocation7 + $0x58] sm:$0xff] }
 0x12a   : > { %3243 = vmatpush3.bf16.msra.mxu0 %v3242_v12  ;;  %v3275_v35 = vpack.c.bf16 %v849_v34, %v848_v33  ;;  %v850_v38 = vld [vmem:[#allocation8 + $0x50] sm:$0xff]  ;;  %v3254_v39 = vpack.c.bf16 %v758_v37, %v757_v36  ;;  %v851_v40 = vld [vmem:[#allocation8 + $0x58] sm:$0xff]  ;;  %v759_v43 = vld [vmem:[#allocation7 + $0x60] sm:$0xff]  ;;  %v3880_v36 = vmov 1983009808  }
 0x12b   : > { %3267 = vmatpush3.bf16.msra.mxu1 %v3266_v13  ;;  %3244 = vmatprep.subr.bf16.mxu0 %v3874_v4  ;;  %v3278_v42 = vpack.c.bf16 %v851_v40, %v850_v38  ;;  %v760_v44 = vld [vmem:[#allocation7 + $0x68] sm:$0xff]  ;;  %v852_v45 = vld [vmem:[#allocation8 + $0x60] sm:$0xff]  ;;  %v761_v49 = vld [vmem:[#allocation7 + $0x70] sm:$0xff]  ;;  %v1039_v37 = vunpack.c.l.s4 %v3880_v36  ;;  %v1041_v38 = vlaneseq }
 0x12c   : > { %3268 = vmatprep.subr.bf16.mxu1 %v3874_v4  ;;  %v853_v46 = vld [vmem:[#allocation8 + $0x68] sm:$0xff]  ;;  %v3257_v47 = vpack.c.bf16 %v760_v44, %v759_v43  ;;  %v762_v50 = vld [vmem:[#allocation7 + $0x78] sm:$0xff]  ;;  %v854_v51 = vld [vmem:[#allocation8 + $0x70] sm:$0xff] }
 0x12d   : > { %v3281_v48 = vpack.c.bf16 %v853_v46, %v852_v45  ;;  %v855_v52 = vld [vmem:[#allocation8 + $0x78] sm:$0xff]  ;;  %v3260_v53 = vpack.c.bf16 %v762_v50, %v761_v49  ;;  %v2892_v59 = vld [vmem:[%s4597_s10] ss:$0 sm:$0xff]  ;;  %v934_v62 = vld [vmem:[#allocation10 + $0x8] sm:$0xff]  ;;  %v4374_v43 = vshrl.u32 %v1041_v38, 7 }
 0x12e   : > { %3246 = vmatpush3.bf16.msra.mxu0 %v3245_v18  ;;  %v3284_v54 = vpack.c.bf16 %v855_v52, %v854_v51  ;;  %v933_v61 = vld [vmem:[#allocation10] sm:$0xff]  ;;  %v935_v5 = vld [vmem:[#allocation10 + $0x10] sm:$0xff]  ;;  %v936_v6 = vld [vmem:[#allocation10 + $0x18] sm:$0xff] }
 0x12f   : > { %3270 = vmatpush3.bf16.msra.mxu1 %v3269_v19  ;;  %3247 = vmatprep.subr.bf16.mxu0 %v3874_v4  ;;  %v2893_v63 = vld [vmem:[%s4598_s11] ss:$0 sm:$0xff]  ;;  %v3287_v2 = vpack.c.bf16 %v934_v62, %v933_v61  ;;  %v3290_v7 = vpack.c.bf16 %v936_v6, %v935_v5  ;;  %v938_v9 = vld [vmem:[#allocation10 + $0x28] sm:$0xff]  ;;  %v939_v11 = vld [vmem:[#allocation10 + $0x30] sm:$0xff] }
 0x130   : > { %3271 = vmatprep.subr.bf16.mxu1 %v3874_v4  ;;  %v937_v8 = vld [vmem:[#allocation10 + $0x20] sm:$0xff]  ;;  %v940_v12 = vld [vmem:[#allocation10 + $0x38] sm:$0xff]  ;;  %v942_v15 = vld [vmem:[#allocation10 + $0x48] sm:$0xff] }
 0x131   : > { %v3293_v10 = vpack.c.bf16 %v938_v9, %v937_v8  ;;  %v3296_v13 = vpack.c.bf16 %v940_v12, %v939_v11  ;;  %v941_v14 = vld [vmem:[#allocation10 + $0x40] sm:$0xff]  ;;  %v943_v17 = vld [vmem:[#allocation10 + $0x50] sm:$0xff]  ;;  %v944_v18 = vld [vmem:[#allocation10 + $0x58] sm:$0xff] }
 0x132   : > { %3249 = vmatpush3.bf16.msra.mxu0 %v3248_v26  ;;  %v3299_v16 = vpack.c.bf16 %v942_v15, %v941_v14  ;;  %v3302_v19 = vpack.c.bf16 %v944_v18, %v943_v17  ;;  %v948_v24 = vld [vmem:[#allocation10 + $0x78] sm:$0xff]  ;;  %v2895_v26 = vld [vmem:[%s4592_s5] ss:$0 sm:$0xff] }
 0x133   : > { %3273 = vmatpush3.bf16.msra.mxu1 %v3272_v29  ;;  %3250 = vmatprep.subr.bf16.mxu0 %v3874_v4 }
 0x134   : > { %3274 = vmatprep.subr.bf16.mxu1 %v3874_v4 }
 0x136   : > { %3252 = vmatpush3.bf16.msra.mxu0 %v3251_v32  ;;  %v2894_v32 = vld [vmem:[%s4661_s2] ss:$0 sm:$0xff]  ;;  %s4666_s2 = sld [smem:[#allocation37_spill]] }
 0x137   : > { %3276 = vmatpush3.bf16.msra.mxu1 %v3275_v35  ;;  %3253 = vmatprep.subr.bf16.mxu0 %v3874_v4 }
 0x138   : > { %3277 = vmatprep.subr.bf16.mxu1 %v3874_v4 }
 0x13a   : > { %3255 = vmatpush3.bf16.msra.mxu0 %v3254_v39  ;;  %v3881_v39 = vmov 1934713408  }
 0x13b   : > { %3279 = vmatpush3.bf16.msra.mxu1 %v3278_v42  ;;  %3256 = vmatprep.subr.bf16.mxu0 %v3874_v4  ;;  %v1071_v40 = vunpack.c.l.s4 %v3881_v39  ;;  %v1040_v42 = vunpack.c.0.s8 %v1039_v37 }
 0x13c   : > { %3280 = vmatprep.subr.bf16.mxu1 %v3874_v4 }
 0x13d   : > { %v1072_v46 = vunpack.c.0.s8 %v1071_v40 }
 0x13e   : > { %3258 = vmatpush3.bf16.msra.mxu0 %v3257_v47  ;;  %v4377_v47 = vsub.s32 %v1040_v42, %v4374_v43 }
 0x13f   : > { %3282 = vmatpush3.bf16.msra.mxu1 %v3281_v48  ;;  %3259 = vmatprep.subr.bf16.mxu0 %v3874_v4 }
 0x140   : > { %3283 = vmatprep.subr.bf16.mxu1 %v3874_v4 }
 0x142   : > { %3261 = vmatpush3.bf16.msra.mxu0 %v3260_v53  ;;  %v4380_v53 = vsub.s32 %v1072_v46, %v4374_v43 }
 0x143   : > { %3285 = vmatpush3.bf16.msra.mxu1 %v3284_v54  ;;  %3286 = vmatprep.subr.bf16.mxu0 %v3874_v4 }
 0x144   : > { %3154 = vmatprep.subr.mxu1 %v3876_v41 }
 0x1b0   : > { %v722_v20 = vpop.xlane.xlu0 %721 }
 0x1b1   : > { %v724_v21 = vmul.f32 0.0078125, %v722_v20  ;;  %v945_v20 = vld [vmem:[#allocation10 + $0x60] sm:$0xff] }
 0x1b3   : > { %v4321_v22 = vsub.f32 %v4309_v0, %v724_v21  ;;  %v946_v21 = vld [vmem:[#allocation10 + $0x68] sm:$0xff] }
 0x1b5   : > { %v726_v23 = vmul.f32 %v4321_v22, %v4321_v22 }
 0x1b7   : > { %727 = vadd.xlane.f32.xlu0 %v726_v23  ;;  %v947_v23 = vld [vmem:[#allocation10 + $0x70] sm:$0xff] }
 0x1b8   : > { %v3308_v25 = vpack.c.bf16 %v948_v24, %v947_v23 }
 0x244   : > { %v728_v55 = vpop.xlane.xlu0 %727 }
 0x245   : > { %v729_v56 = vmul.f32 0.0078125, %v728_v55 }
 0x247   : > { %v730_v57 = vadd.f32 1e-05, %v729_v56 }
 0x249   : > { %3522 = vrsqrt.f32 %v730_v57 }
 0x253   : > { %v3523_v58 = vpop.eup %3522 }
 0x254   : > { %v732_v60 = vmul.f32 %v3523_v58, %v4321_v22  ;;  %v3305_v22 = vpack.c.bf16 %v946_v21, %v945_v20 }
 0x256   : > { %v739_v1 = vmul.f32 %v2892_v59, %v732_v60 }
 0x258   : > { %v746_v3 = vadd.f32 %v2893_v63, %v739_v1 }
 0x25a   : > { %3082 = vmatmul.mubr.f32.vlgmr.msra.gmra.mrb[0].mxu0 %v746_v3  ;;  %3117 = vmatmul.mubr.f32.vlgmr.msra.gmra.mrb[0].mxu1 %v746_v3 }
 0x25b   : > { %3288 = vmatpush3.bf16.msra.mxu0 %v3287_v2  ;;  %3151 = vmatprep.mubr.msk.f32.mxu0 %vm3875_vm0, %v3876_v41 }
 0x25c   : > { %3289 = vmatprep.subr.bf16.mxu0 %v3874_v4  ;;  %3156 = vmatprep.mubr.msk.f32.mxu1 %vm3875_vm0, %v3876_v41 }
 0x25f   : > { %3291 = vmatpush3.bf16.msra.mxu0 %v3290_v7 }
 0x260   : > { %3292 = vmatprep.subr.bf16.mxu0 %v3874_v4 }
 0x263   : > { %3294 = vmatpush3.bf16.msra.mxu0 %v3293_v10 }
 0x264   : > { %3295 = vmatprep.subr.bf16.mxu0 %v3874_v4 }
 0x267   : > { %3297 = vmatpush3.bf16.msra.mxu0 %v3296_v13 }
 0x268   : > { %3298 = vmatprep.subr.bf16.mxu0 %v3874_v4 }
 0x26b   : > { %3300 = vmatpush3.bf16.msra.mxu0 %v3299_v16 }
 0x26c   : > { %3301 = vmatprep.subr.bf16.mxu0 %v3874_v4 }
 0x26f   : > { %3303 = vmatpush3.bf16.msra.mxu0 %v3302_v19 }
 0x270   : > { %3304 = vmatprep.subr.bf16.mxu0 %v3874_v4 }
 0x273   : > { %3306 = vmatpush3.bf16.msra.mxu0 %v3305_v22 }
 0x274   : > { %3307 = vmatprep.subr.bf16.mxu0 %v3874_v4 }
 0x277   : > { %3309 = vmatpush3.bf16.msra.mxu0 %v3308_v25 }
 0x278   : > { %3310 = vmatprep.subr.bf16.mxu0 %v3874_v4 }
 0x27a   : > { %3152 = vmatmul.mubr.f32.vlgmr.msra.gmra.mrb[2].mxu0 %v746_v3 }
 0x27b   : > { %3202 = vmatprep.mubr.msk.f32.mxu0 %vm3875_vm0, %v3876_v41 }
 0x32d   : > { %v836_v27 = vpop.f32.mrb[0].mxu0  ;;  %v929_v28 = vpop.f32.mrb[0].mxu1 }
 0x32e   : > { %v930_v29 = vadd.f32 %v2895_v26, %v929_v28  ;;  %v3083_v30 = vpop.f32.mrb[1].mxu0  ;;  %v3118_v31 = vpop.f32.mrb[1].mxu1  ;;  %v837_v33 = vadd.f32 %v2894_v32, %v836_v27 }
 0x330   : > { %1179 = vrot.lane.b32.xlu0 %v930_v29, %s3877_s7  ;;  %1173 = vrot.lane.b32.xlu1 %v930_v29, %s3878_s8 }
 0x334   : > { %1176 = vrot.lane.b32.xlu1 %v930_v29, %s3879_s24 }
 0x338   : > { %1027 = vrot.lane.b32.xlu1 %v837_v33, %s3878_s8 }
 0x33c   : > { %1030 = vrot.lane.b32.xlu1 %v837_v33, %s3879_s24 }
 0x340   : > { %1033 = vrot.lane.b32.xlu1 %v837_v33, %s3877_s7 }
 0x34d   : > { %v4372_v34 = vpop.f32.mrb[2].mxu0 }
 0x34e   : > { %v3153_v35 = vpop.f32.mrb[3].mxu0 }
 0x3a2   : > { %v1180_v44 = vpop.permute.xlu0 %1179  ;;  %v1174_v45 = vpop.permute.xlu1 %1173 }
 0x3a3   : > { %v1198_v48 = vcombine.low %v1174_v45, %v1180_v44  ;;  %v1199_v49 = vcombine.high %v1174_v45, %v1180_v44 }
 0x3a5   : > { %v1206_v54 = vrot.slane %v1198_v48, %v4377_v47  ;;  %v1213_v55 = vrot.slane %v1199_v49, %v4377_v47 }
 0x3a6   : > { %v1177_v50 = vpop.permute.xlu1 %1176 }
 0x3a7   : > { %v1182_v51 = vcombine.low %v930_v29, %v1177_v50  ;;  %v1183_v52 = vcombine.high %v930_v29, %v1177_v50 }
 0x3a9   : > { %v1190_v56 = vrot.slane %v1182_v51, %v4377_v47  ;;  %v1197_v57 = vrot.slane %v1183_v52, %v4377_v47 }
 0x3aa   : > { %v1028_v58 = vpop.permute.xlu1 %1027 }
 0x3ab   : > { %v1214_v59 = vcombine.low %v1190_v56, %v1206_v54  ;;  %v1215_v60 = vcombine.high %v1190_v56, %v1206_v54  ;;  %v1230_v61 = vcombine.low %v1197_v57, %v1213_v55  ;;  %v1231_v62 = vcombine.high %v1197_v57, %v1213_v55 }
 0x3ad   : > { %v1222_v63 = vrot.slane %v1214_v59, %v4380_v53  ;;  %v1229_v1 = vrot.slane %v1215_v60, %v4380_v53  ;;  %v1238_v2 = vrot.slane %v1230_v61, %v4380_v53  ;;  %v1245_v3 = vrot.slane %v1231_v62, %v4380_v53 }
 0x3ae   : > { %v1031_v5 = vpop.permute.xlu1 %1030 }
 0x3af   : > { %v1250_v6 = vcombine.low %v1222_v63, %v1229_v1  ;;  %v2899_v7 = vcombine.high %v1222_v63, %v1229_v1  ;;  %v1266_v8 = vcombine.low %v1238_v2, %v1245_v3  ;;  %v2900_v9 = vcombine.high %v1238_v2, %v1245_v3 }
 0x3b0   : > { %v1036_v14 = vcombine.low %v837_v33, %v1031_v5  ;;  %v1037_v15 = vcombine.high %v837_v33, %v1031_v5 }
 0x3b1   : > { %v1257_v10 = vrot.slane %v1250_v6, %v4377_v47  ;;  %v1265_v11 = vrot.slane %v2899_v7, %v4377_v47  ;;  %v1273_v12 = vrot.slane %v1266_v8, %v4377_v47  ;;  %v1281_v13 = vrot.slane %v2900_v9, %v4377_v47  ;;  %v716_v6 = vld [vmem:[%s633_s19] sm:$0xff]  ;;  %s714_s19 = scalar_lea.vmem [#allocation16], %s4279_s14 }
 0x3b2   : > { %v1034_v16 = vpop.permute.xlu1 %1033  ;;  %v1044_v23 = vrot.slane %v1036_v14, %v4377_v47  ;;  %v1051_v24 = vrot.slane %v1037_v15, %v4377_v47  ;;  %vm717_vm2 = vcmp.ne.s32.totalorder %v716_v6, 0  ;;  %s2719_s13 = sshll.u32 %s714_s19, 4  ;;  %s4545_s13 = int_to_ptr.vmem [resolvable:$true] %s2719_s13 }
 0x3b3   : > { %v1282_v17 = vcombine.low %v1257_v10, %v1265_v11  ;;  %v1298_v18 = vcombine.low %v1273_v12, %v1281_v13  ;;  %v1052_v19 = vcombine.low %v1028_v58, %v1034_v16  ;;  %v1053_v20 = vcombine.high %v1028_v58, %v1034_v16 }
 0x3b4   : > { %v1283_v50 = vcombine.high %v1257_v10, %v1265_v11  ;;  %v1299_v51 = vcombine.high %v1273_v12, %v1281_v13  ;;  %v718_v8 = vsel %vm717_vm2, -1e+09, %v3876_v41 }
 0x3b5   : > { %v1290_v21 = vrot.slane %v1282_v17, %v4380_v53  ;;  %v1306_v22 = vrot.slane %v1298_v18, %v4380_v53  ;;  %v1060_v25 = vrot.slane %v1052_v19, %v4377_v47  ;;  %v1067_v26 = vrot.slane %v1053_v20, %v4377_v47 }
 0x3b6   : > { %v1297_v59 = vrot.slane %v1283_v50, %v4380_v53  ;;  %v1313_v60 = vrot.slane %v1299_v51, %v4380_v53 }
 0x3b7   : > { %v1314_v27 = vcombine.low %v1290_v21, %v1306_v22  ;;  %v1068_v28 = vcombine.low %v1044_v23, %v1060_v25  ;;  %v1069_v29 = vcombine.high %v1044_v23, %v1060_v25  ;;  %v1084_v30 = vcombine.low %v1051_v24, %v1067_v26 }
 0x3b8   : > { %v1085_v31 = vcombine.high %v1051_v24, %v1067_v26  ;;  %v1315_v58 = vcombine.high %v1290_v21, %v1306_v22  ;;  %v1316_v1 = vcombine.low %v1297_v59, %v1313_v60  ;;  %v1317_v3 = vcombine.high %v1297_v59, %v1313_v60 }
 0x3b9   : > { %3155 = vmatpush3.xpose.msk.msra.mxu1 %vm1464_vm1, %v1314_v27  ;;  %v1076_v32 = vrot.slane %v1068_v28, %v4380_v53  ;;  %v1083_v33 = vrot.slane %v1069_v29, %v4380_v53  ;;  %v1092_v35 = vrot.slane %v1084_v30, %v4380_v53  ;;  %v2896_v28 = vld [vmem:[%s4662_s0] ss:$0 sm:$0xff]  ;;  %s2924_s0 = sshll.u32 %s3999_s1, 7  ;;  %s3882_s1 = smov [#allocation16]  }
 0x3ba   : > { %v1099_v36 = vrot.slane %v1085_v31, %v4380_v53  ;;  %3159 = vmatprep.subr.mxu1 %v3876_v41  ;;  %v1023_v29 = vadd.f32 %v2896_v28, %v4372_v34  ;;  %s3778_s14 = sshll.u32 %s3882_s1, 4  ;;  %s3779_s14 = int_to_ptr.vmem [resolvable:$false] %s3778_s14 }
 0x3bb   : > { %v1104_v37 = vcombine.low %v1076_v32, %v1083_v33  ;;  %v2897_v38 = vcombine.high %v1076_v32, %v1083_v33  ;;  %p3781_p3 = scmp.lt.s32.totalorder %s4545_s13, %s3779_s14 }
 0x3bc   : > { %v1120_v39 = vcombine.low %v1092_v35, %v1099_v36  ;;  %v2898_v40 = vcombine.high %v1092_v35, %v1099_v36 }
 0x3bd   : > { %v1111_v42 = vrot.slane %v1104_v37, %v4377_v47  ;;  %v1119_v44 = vrot.slane %v2897_v38, %v4377_v47 }
 0x3be   : > { %v1127_v45 = vrot.slane %v1120_v39, %v4377_v47  ;;  %v1135_v46 = vrot.slane %v2898_v40, %v4377_v47 }
 0x3bf   : > { %v1136_v48 = vcombine.low %v1111_v42, %v1119_v44  ;;  %v1137_v55 = vcombine.high %v1111_v42, %v1119_v44 }
 0x3c0   : > { %v1152_v49 = vcombine.low %v1127_v45, %v1135_v46  ;;  %v1153_v56 = vcombine.high %v1127_v45, %v1135_v46 }
 0x3c1   : > { %v1144_v52 = vrot.slane %v1136_v48, %v4380_v53  ;;  %v1151_v62 = vrot.slane %v1137_v55, %v4380_v53  ;;  %v2115_v55 = vld [vmem:[#allocation11 + $0x8] sm:$0xff] }
 0x3c2   : > { %v1160_v54 = vrot.slane %v1152_v49, %v4380_v53  ;;  %v1167_v63 = vrot.slane %v1153_v56, %v4380_v53  ;;  %v2116_v56 = vld [vmem:[#allocation11 + $0x10] sm:$0xff] }
 0x3c4   : > { %v1168_v57 = vcombine.low %v1144_v52, %v1160_v54  ;;  %v1169_v61 = vcombine.high %v1144_v52, %v1160_v54  ;;  %v1170_v2 = vcombine.low %v1151_v62, %v1167_v63  ;;  %v1171_v5 = vcombine.high %v1151_v62, %v1167_v63  ;;  %v2114_v54 = vld [vmem:[#allocation11] sm:$0xff] }
 0x3c6   : > { %3157 = vmatmul.mubr.msk.f32.vlgmr.msra.gmra.mrb[2].mxu1 %vm1464_vm1, %v1168_v57  ;;  %v3311_v57 = vpack.c.bf16 %v2115_v55, %v2114_v54 }
 0x3c7   : > { %3160 = vmatpush3.xpose.msk.msra.mxu1 %vm1464_vm1, %v1315_v58  ;;  %3161 = vmatprep.mubr.msk.f32.mxu1 %vm3875_vm0, %v3876_v41  ;;  %v2117_v58 = vld [vmem:[#allocation11 + $0x18] sm:$0xff] }
 0x3c8   : > { %3164 = vmatprep.subr.mxu1 %v3876_v41  ;;  %3312 = vmatpush3.bf16.msra.mxu0 %v3311_v57  ;;  %v3314_v59 = vpack.c.bf16 %v2117_v58, %v2116_v56  ;;  %v2121_v56 = vld [vmem:[#allocation11 + $0x38] sm:$0xff]  ;;  %v2122_v58 = vld [vmem:[#allocation11 + $0x40] sm:$0xff] }
 0x3c9   : > { %3313 = vmatprep.subr.bf16.mxu0 %v3874_v4 }
 0x3ca   : > { %3162 = vmatmul.mubr.msk.f32.vlgmr.msra.gmra.mrb[4].mxu1 %vm1464_vm1, %v1169_v61 }
 0x3cb   : > { %3165 = vmatpush3.xpose.msk.msra.mxu1 %vm1464_vm1, %v1316_v1  ;;  %3166 = vmatprep.mubr.msk.f32.mxu1 %vm3875_vm0, %v3876_v41 }
 0x3cc   : > { %3169 = vmatprep.subr.mxu1 %v3876_v41  ;;  %3315 = vmatpush3.bf16.msra.mxu0 %v3314_v59  ;;  %v2123_v59 = vld [vmem:[#allocation11 + $0x48] sm:$0xff] }
 0x3cd   : > { %3322 = vmatprep.subr.bf16.mxu0 %v3874_v4 }
 0x3ce   : > { %3167 = vmatmul.mubr.msk.f32.vlgmr.msra.gmra.mrb[6].mxu1 %vm1464_vm1, %v1170_v2 }
 0x3cf   : > { %3170 = vmatpush3.xpose.msk.msra.mxu1 %vm1464_vm1, %v1317_v3  ;;  %3171 = vmatprep.mubr.msk.f32.mxu1 %vm3875_vm0, %v3876_v41 }
 0x3d0   : > { %3174 = vmatprep.subr.mxu1 %v3876_v41 }
 0x3d2   : > { %3172 = vmatmul.mubr.msk.f32.vlgmr.msra.gmra.mrb[8].mxu1 %vm1464_vm1, %v1171_v5 }
 0x3d3   : > { %3176 = vmatprep.mubr.msk.f32.mxu1 %vm3875_vm0, %v3876_v41 }
 0x499   : > { %v1537_v7 = vpop.f32.mrb[2].mxu1 }
 0x49a   : > { %v1769_v9 = vmul.f32 0.17677669, %v1537_v7  ;;  %v3158_v10 = vpop.f32.mrb[3].mxu1 }
 0x49c   : > { %v1773_v11 = vadd.f32 %v1769_v9, %v718_v8 }
 0x49d   : > { %v1613_v12 = vpop.f32.mrb[4].mxu1 }
 0x49e   : > { %v1770_v13 = vmul.f32 0.17677669, %v1613_v12  ;;  %v3163_v14 = vpop.f32.mrb[5].mxu1  ;;  %v1778_v15 = vsel %vm1777_vm3, %v1773_v11, -inf }
 0x49f   : > { %1779 = vmax.xlane.f32.xlu1 %v1778_v15 }
 0x4a0   : > { %v1774_v16 = vadd.f32 %v1770_v13, %v718_v8 }
 0x4a1   : > { %v1689_v17 = vpop.f32.mrb[6].mxu1 }
 0x4a2   : > { %v1771_v18 = vmul.f32 0.17677669, %v1689_v17  ;;  %v3168_v19 = vpop.f32.mrb[7].mxu1  ;;  %v1781_v20 = vsel %vm1777_vm3, %v1774_v16, -inf }
 0x4a3   : > { %1782 = vmax.xlane.f32.xlu0 %v1781_v20 }
 0x4a4   : > { %v1775_v21 = vadd.f32 %v1771_v18, %v718_v8 }
 0x4a5   : > { %v1765_v22 = vpop.f32.mrb[8].mxu1 }
 0x4a6   : > { %v1772_v23 = vmul.f32 0.17677669, %v1765_v22  ;;  %v3173_v24 = vpop.f32.mrb[9].mxu1  ;;  %v1784_v25 = vsel %vm1777_vm3, %v1775_v21, -inf }
 0x4a7   : > { %1785 = vmax.xlane.f32.xlu1 %v1784_v25 }
 0x4a8   : > { %v1776_v26 = vadd.f32 %v1772_v23, %v718_v8 }
 0x4aa   : > { %v1787_v27 = vsel %vm1777_vm3, %v1776_v26, -inf }
 0x4ab   : > { %1788 = vmax.xlane.f32.xlu1 %v1787_v27 }
 0x4bc   : > { %1322 = vrot.lane.b32.xlu1 %v1023_v29, %s3879_s24 }
 0x52c   : > { %v1780_v30 = vpop.xlane.xlu1 %1779 }
 0x52d   : > { %v1790_v31 = vsub.f32 %v1773_v11, %v1780_v30 }
 0x52f   : > { %v1794_v32 = vmul.f32 1.442695, %v1790_v31 }
 0x530   : > { %v1783_v33 = vpop.xlane.xlu0 %1782 }
 0x531   : > { %3524 = vpow2.f32 %v1794_v32  ;;  %v1791_v35 = vsub.f32 %v1774_v16, %v1783_v33 }
 0x533   : > { %v1796_v36 = vmul.f32 1.442695, %v1791_v35 }
 0x534   : > { %v1786_v40 = vpop.xlane.xlu1 %1785 }
 0x535   : > { %3526 = vpow2.f32 %v1796_v36  ;;  %v1792_v42 = vsub.f32 %v1775_v21, %v1786_v40 }
 0x537   : > { %v1798_v45 = vmul.f32 1.442695, %v1792_v42 }
 0x538   : > { %v1789_v44 = vpop.xlane.xlu1 %1788 }
 0x539   : > { %v1793_v46 = vsub.f32 %v1776_v26, %v1789_v44  ;;  %3528 = vpow2.f32 %v1798_v45 }
 0x53b   : > { %v4446_v37 = vpop.eup %3524  ;;  %v1800_v48 = vmul.f32 1.442695, %v1793_v46 }
 0x53c   : > { %v1802_v38 = vsel %vm1777_vm3, %v4446_v37, 0.0  ;;  %v1323_v60 = vpop.permute.xlu1 %1322 }
 0x53d   : > { %1803 = vadd.xlane.f32.xlu0 %v1802_v38  ;;  %3530 = vpow2.f32 %v1800_v48  ;;  %v1328_v63 = vcombine.low %v1023_v29, %v1323_v60  ;;  %v1329_v1 = vcombine.high %v1023_v29, %v1323_v60  ;;  %v2118_v48 = vld [vmem:[#allocation11 + $0x20] sm:$0xff]  ;;  %v3323_v60 = vpack.c.bf16 %v2123_v59, %v2122_v58  ;;  %v2480_v58 = vld [vmem:[#allocation13 + $0x98] sm:$0xff] }
 0x53f   : > { %v4450_v39 = vpop.eup %3526  ;;  %v1336_v7 = vrot.slane %v1328_v63, %v4377_v47  ;;  %v1343_v8 = vrot.slane %v1329_v1, %v4377_v47  ;;  %v2127_v63 = vld [vmem:[#allocation11 + $0x68] sm:$0xff] }
 0x540   : > { %v1805_v34 = vsel %vm1777_vm3, %v4450_v39, 0.0 }
 0x541   : > { %1806 = vadd.xlane.f32.xlu1 %v1805_v34 }
 0x543   : > { %v4456_v49 = vpop.eup %3528 }
 0x544   : > { %v1808_v50 = vsel %vm1777_vm3, %v4456_v49, 0.0 }
 0x547   : > { %v4460_v51 = vpop.eup %3530 }
 0x548   : > { %v1811_v52 = vsel %vm1777_vm3, %v4460_v51, 0.0 }
 0x552   : > { %1325 = vrot.lane.b32.xlu1 %v1023_v29, %s3877_s7  ;;  %s3774_s7 = scalar_lea.vmem %s4545_s13, 128 }
 0x553   : > { %1319 = vrot.lane.b32.xlu0 %v1023_v29, %s3878_s8  ;;  %s4665_s8 = sld [smem:[#allocation35_spill]]  ;;  %p3775_p4 = scmp.ne.s32.totalorder %s4545_s13, %s3774_s7 }
 0x555   : > { %p3776_p5 = pnand %p3775_p4, %p4669_p10 }
 0x557   : > { %p3777_p7 = pneg %p3776_p5 }
 0x572   : > { %1809 = vadd.xlane.f32.xlu0 %v1808_v50 }
 0x576   : > { %1812 = vadd.xlane.f32.xlu1 %v1811_v52 }
 0x5ca   : > { %v1804_v61 = vpop.xlane.xlu0 %1803 }
 0x5cb   : > { %3532 = vrcp.f32 %v1804_v61  ;;  %v2125_v61 = vld [vmem:[#allocation11 + $0x58] sm:$0xff] }
 0x5ce   : > { %v1807_v62 = vpop.xlane.xlu1 %1806  ;;  %v1320_v2 = vpop.permute.xlu0 %1319 }
 0x5cf   : > { %3534 = vrcp.f32 %v1807_v62  ;;  %v2126_v62 = vld [vmem:[#allocation11 + $0x60] sm:$0xff] }
 0x5d2   : > { %v1326_v3 = vpop.permute.xlu1 %1325 }
 0x5d3   : > { %v1344_v5 = vcombine.low %v1320_v2, %v1326_v3  ;;  %v1345_v6 = vcombine.high %v1320_v2, %v1326_v3 }
 0x5d5   : > { %v1352_v9 = vrot.slane %v1344_v5, %v4377_v47  ;;  %v1359_v10 = vrot.slane %v1345_v6, %v4377_v47  ;;  %v3533_v29 = vpop.eup %3532  ;;  %v3329_v5 = vpack.c.bf16 %v2127_v63, %v2126_v62  ;;  %v2128_v6 = vld [vmem:[#allocation11 + $0x70] sm:$0xff]  ;;  %v2484_v63 = vld [vmem:[#allocation13 + $0xb8] sm:$0xff] }
 0x5d6   : > { %v1818_v38 = vmul.f32 %v3533_v29, %v4446_v37  ;;  %v2461_v29 = vld [vmem:[#allocation13] sm:$0xff] }
 0x5d7   : > { %v1360_v11 = vcombine.low %v1336_v7, %v1352_v9  ;;  %v1361_v12 = vcombine.high %v1336_v7, %v1352_v9  ;;  %v1376_v13 = vcombine.low %v1343_v8, %v1359_v10  ;;  %v1377_v14 = vcombine.high %v1343_v8, %v1359_v10  ;;  %v2129_v7 = vld [vmem:[#allocation11 + $0x78] sm:$0xff] }
 0x5d8   : > { %v3332_v10 = vpack.c.bf16 %v2129_v7, %v2128_v6  ;;  %v2488_v6 = vld [vmem:[#allocation13 + $0xd8] sm:$0xff] }
 0x5d9   : > { %v1368_v15 = vrot.slane %v1360_v11, %v4380_v53  ;;  %v1375_v16 = vrot.slane %v1361_v12, %v4380_v53  ;;  %v1384_v17 = vrot.slane %v1376_v13, %v4380_v53  ;;  %v1391_v18 = vrot.slane %v1377_v14, %v4380_v53  ;;  %v3535_v36 = vpop.eup %3534 }
 0x5db   : > { %v1396_v19 = vcombine.low %v1368_v15, %v1375_v16  ;;  %v2901_v20 = vcombine.high %v1368_v15, %v1375_v16  ;;  %v1412_v21 = vcombine.low %v1384_v17, %v1391_v18  ;;  %v2902_v22 = vcombine.high %v1384_v17, %v1391_v18 }
 0x5dd   : > { %v1403_v23 = vrot.slane %v1396_v19, %v4377_v47  ;;  %v1411_v24 = vrot.slane %v2901_v20, %v4377_v47  ;;  %v1419_v25 = vrot.slane %v1412_v21, %v4377_v47  ;;  %v1427_v26 = vrot.slane %v2902_v22, %v4377_v47 }
 0x5de   : > { %v1819_v47 = vmul.f32 %v3535_v36, %v4450_v39  ;;  %v2119_v39 = vld [vmem:[#allocation11 + $0x28] sm:$0xff] }
 0x5df   : > { %v1428_v27 = vcombine.low %v1403_v23, %v1411_v24  ;;  %v1444_v28 = vcombine.low %v1419_v25, %v1427_v26  ;;  %v1429_v32 = vcombine.high %v1403_v23, %v1411_v24  ;;  %v1445_v33 = vcombine.high %v1419_v25, %v1427_v26  ;;  %v2919_v23 = vld [vmem:[%s4663_s16] ss:$0 sm:$0xff] }
 0x5e0   : > { %v3317_v54 = vpack.c.bf16 %v2119_v39, %v2118_v48 }
 0x5e1   : > { %v1436_v30 = vrot.slane %v1428_v27, %v4380_v53  ;;  %v1452_v31 = vrot.slane %v1444_v28, %v4380_v53  ;;  %v1443_v40 = vrot.slane %v1429_v32, %v4380_v53  ;;  %v1459_v42 = vrot.slane %v1445_v33, %v4380_v53  ;;  %v2462_v27 = vld [vmem:[#allocation13 + $0x8] sm:$0xff]  ;;  %v2464_v28 = vld [vmem:[#allocation13 + $0x18] sm:$0xff] }
 0x5e2   : > { %v2466_v32 = vld [vmem:[#allocation13 + $0x28] sm:$0xff]  ;;  %v2468_v33 = vld [vmem:[#allocation13 + $0x38] sm:$0xff] }
 0x5e3   : > { %v1460_v35 = vcombine.low %v1436_v30, %v1452_v31  ;;  %v1461_v34 = vcombine.high %v1436_v30, %v1452_v31  ;;  %v1462_v44 = vcombine.low %v1443_v40, %v1459_v42  ;;  %v1463_v50 = vcombine.high %v1443_v40, %v1459_v42  ;;  %v2463_v31 = vld [vmem:[#allocation13 + $0x10] sm:$0xff]  ;;  %v2470_v40 = vld [vmem:[#allocation13 + $0x48] sm:$0xff]  ;;  %v2472_v42 = vld [vmem:[#allocation13 + $0x58] sm:$0xff] }
 0x5e4   : > { %v3334_v30 = vpack.c.bf16 %v2464_v28, %v2462_v27  ;;  %v3338_v36 = vpack.c.bf16 %v2468_v33, %v2466_v32  ;;  %v2920_v27 = vld [vmem:[%s4664_s22] ss:$0 sm:$0xff]  ;;  %v2612_v32 = vld [vmem:[#allocation14 + $0x90] sm:$0xff]  ;;  %v2613_v33 = vld [vmem:[#allocation14 + $0x98] sm:$0xff]  ;;  %s4543_s22 = scalar_lea.hbm %s4668_s12, %s2924_s0 }
 0x5e5   : > { %3175 = vmatpush3.msra.mxu1 %v1460_v35  ;;  %v3336_v35 = vpack.c.bf16 %v2463_v31, %v2461_v29  ;;  %v2921_v29 = vld [vmem:[%s4665_s8] ss:$0 sm:$0xff]  ;;  %s3780_s8 = scalar_lea.vmem %s3779_s14, 256 }
 0x5e6   : > { %3177 = vmatmul.mubr.msk.f32.vlgmr.msra.gmra.mrb[10].mxu1 %vm1777_vm3, %v1818_v38  ;;  %3179 = vmatprep.subr.mxu1 %v3876_v41  ;;  %v2465_v38 = vld [vmem:[#allocation13 + $0x20] sm:$0xff]  ;;  %p3782_p6 = scmp.lt.s32.totalorder %s3780_s8, %s3774_s7 }
 0x5e7   : > { %3180 = vmatpush3.msra.mxu1 %v1461_v34  ;;  %3181 = vmatprep.mubr.msk.f32.mxu1 %vm3875_vm0, %v3876_v41  ;;  %v2467_v34 = vld [vmem:[#allocation13 + $0x30] sm:$0xff] }
 0x5e8   : > { %3184 = vmatprep.subr.mxu1 %v3876_v41  ;;  %p3783_p11 = por %p3782_p6, %p3781_p3 }
 0x5ea   : > { %3182 = vmatmul.mubr.msk.f32.vlgmr.msra.gmra.mrb[12].mxu1 %vm1777_vm3, %v1819_v47  ;;  %v3340_v47 = vpack.c.bf16 %v2467_v34, %v2465_v38  ;;  %v2597_v38 = vld [vmem:[#allocation14 + $0x18] sm:$0xff]  ;;  %p3784_p8 = pnand %p3783_p11, %p3777_p7 }
 0x5eb   : > { %3185 = vmatpush3.msra.mxu1 %v1462_v44  ;;  %3186 = vmatprep.mubr.msk.f32.mxu1 %vm3875_vm0, %v3876_v41  ;;  %v2469_v44 = vld [vmem:[#allocation13 + $0x40] sm:$0xff] }
 0x5ec   : > { %3189 = vmatprep.subr.mxu1 %v3876_v41 }
 0x5ff   : > { %v1810_v53 = vpop.xlane.xlu0 %1809 }
 0x600   : > { %3536 = vrcp.f32 %v1810_v53  ;;  %v2471_v53 = vld [vmem:[#allocation13 + $0x50] sm:$0xff] }
 0x603   : > { %v1813_v37 = vpop.xlane.xlu1 %1812 }
 0x604   : > { %3538 = vrcp.f32 %v1813_v37  ;;  %v3344_v37 = vpack.c.bf16 %v2471_v53, %v2469_v44  ;;  %v2599_v44 = vld [vmem:[#allocation14 + $0x28] sm:$0xff] }
 0x60a   : > { %v3537_v45 = vpop.eup %3536 }
 0x60b   : > { %v1820_v46 = vmul.f32 %v3537_v45, %v4456_v49  ;;  %v2120_v49 = vld [vmem:[#allocation11 + $0x30] sm:$0xff] }
 0x60c   : > { %v3320_v57 = vpack.c.bf16 %v2121_v56, %v2120_v49  ;;  %v2475_v49 = vld [vmem:[#allocation13 + $0x70] sm:$0xff] }
 0x60d   : > { %3187 = vmatmul.mubr.msk.f32.vlgmr.msra.gmra.mrb[14].mxu1 %vm1777_vm3, %v1820_v46 }
 0x60e   : > { %v3539_v52 = vpop.eup %3538  ;;  %3190 = vmatpush3.msra.mxu1 %v1463_v50  ;;  %3191 = vmatprep.mubr.msk.f32.mxu1 %vm3875_vm0, %v3876_v41  ;;  %v2474_v50 = vld [vmem:[#allocation13 + $0x68] sm:$0xff] }
 0x60f   : > { %v1821_v55 = vmul.f32 %v3539_v52, %v4460_v51  ;;  %3316 = vmatprep.subr.bf16.mxu1 %v3874_v4  ;;  %v2124_v51 = vld [vmem:[#allocation11 + $0x50] sm:$0xff]  ;;  %v2476_v52 = vld [vmem:[#allocation13 + $0x78] sm:$0xff] }
 0x610   : > { %v3326_v3 = vpack.c.bf16 %v2125_v61, %v2124_v51  ;;  %v2479_v51 = vld [vmem:[#allocation13 + $0x90] sm:$0xff]  ;;  %v2482_v61 = vld [vmem:[#allocation13 + $0xa8] sm:$0xff] }
 0x611   : > { %3192 = vmatmul.mubr.msk.f32.vlgmr.msra.gmra.mrb[16].mxu1 %vm1777_vm3, %v1821_v55  ;;  %v2473_v55 = vld [vmem:[#allocation13 + $0x60] sm:$0xff] }
 0x612   : > { %3318 = vmatpush3.bf16.msra.mxu1 %v3317_v54  ;;  %3213 = vmatprep.mubr.msk.f32.mxu1 %vm3875_vm0, %v3876_v41  ;;  %v3346_v54 = vpack.c.bf16 %v2476_v52, %v2474_v50  ;;  %v3348_v56 = vpack.c.bf16 %v2475_v49, %v2473_v55  ;;  %v2618_v50 = vld [vmem:[#allocation14 + $0xc0] sm:$0xff]  ;;  %v2603_v49 = vld [vmem:[#allocation14 + $0x48] sm:$0xff] }
 0x613   : > { %3319 = vmatprep.subr.bf16.mxu1 %v3874_v4  ;;  %v2602_v55 = vld [vmem:[#allocation14 + $0x40] sm:$0xff] }
 0x616   : > { %3321 = vmatpush3.bf16.msra.mxu1 %v3320_v57  ;;  %v2478_v57 = vld [vmem:[#allocation13 + $0x88] sm:$0xff] }
 0x617   : > { %3328 = vmatprep.subr.bf16.mxu1 %v3874_v4  ;;  %v3350_v59 = vpack.c.bf16 %v2480_v58, %v2478_v57  ;;  %v2620_v57 = vld [vmem:[#allocation14 + $0xd0] sm:$0xff]  ;;  %v2621_v58 = vld [vmem:[#allocation14 + $0xd8] sm:$0xff] }
 0x6b9   : > { %v1891_v1 = vpop.f32.mrb[10].mxu1 }
 0x6ba   : > { %v3178_v2 = vpop.f32.mrb[11].mxu1  ;;  %3203 = vmatmul.mubr.msk.f32.vlgmr.msra.gmra.mrb[4].mxu0 %vm1464_vm1, %v1891_v1  ;;  %v2481_v1 = vld [vmem:[#allocation13 + $0xa0] sm:$0xff] }
 0x6bb   : > { %3324 = vmatpush3.bf16.msra.mxu0 %v3323_v60  ;;  %3224 = vmatprep.mubr.msk.f32.mxu0 %vm3875_vm0, %v3876_v41  ;;  %v2477_v60 = vld [vmem:[#allocation13 + $0x80] sm:$0xff]  ;;  %v2483_v2 = vld [vmem:[#allocation13 + $0xb0] sm:$0xff] }
 0x6bc   : > { %3325 = vmatprep.subr.bf16.mxu0 %v3874_v4  ;;  %v3352_v62 = vpack.c.bf16 %v2479_v51, %v2477_v60  ;;  %v3356_v7 = vpack.c.bf16 %v2483_v2, %v2481_v1  ;;  %v3386_v60 = vpack.c.bf16 %v2621_v58, %v2620_v57  ;;  %v2604_v51 = vld [vmem:[#allocation14 + $0x50] sm:$0xff] }
 0x6bd   : > { %v1964_v8 = vpop.f32.mrb[12].mxu1 }
 0x6be   : > { %v3183_v9 = vpop.f32.mrb[13].mxu1  ;;  %3214 = vmatmul.mubr.msk.f32.vlgmr.msra.gmra.mrb[18].mxu1 %vm1464_vm1, %v1964_v8 }
 0x6bf   : > { %3327 = vmatpush3.bf16.msra.mxu0 %v3326_v3  ;;  %3330 = vmatpush3.bf16.msra.mxu1 %v3329_v5  ;;  %v3354_v3 = vpack.c.bf16 %v2484_v63, %v2482_v61  ;;  %v2486_v5 = vld [vmem:[#allocation13 + $0xc8] sm:$0xff]  ;;  %v2485_v9 = vld [vmem:[#allocation13 + $0xc0] sm:$0xff]  ;;  %v2605_v61 = vld [vmem:[#allocation14 + $0x58] sm:$0xff] }
 0x6c0   : > { %3331 = vmatprep.subr.bf16.mxu1 %v3874_v4  ;;  %3235 = vmatprep.mubr.msk.f32.mxu1 %vm3875_vm0, %v3876_v41  ;;  %v3358_v8 = vpack.c.bf16 %v2488_v6, %v2486_v5  ;;  %v2623_v63 = vld [vmem:[#allocation14 + $0xe8] sm:$0xff]  ;;  %v3388_v1 = vpack.c.bf16 %v2605_v61, %v2604_v51  ;;  %v2624_v6 = vld [vmem:[#allocation14 + $0xf0] sm:$0xff] }
 0x6c1   : > { %3335 = vmatprep.subr.bf16.mxu0 %v3334_v30  ;;  %v2607_v5 = vld [vmem:[#allocation14 + $0x68] sm:$0xff] }
 0x6c3   : > { %3333 = vmatpush3.bf16.msra.mxu1 %v3332_v10  ;;  %v2487_v10 = vld [vmem:[#allocation13 + $0xd0] sm:$0xff] }
 0x6e0   : > { %v2037_v11 = vpop.f32.mrb[14].mxu1 }
 0x6e1   : > { %v3188_v12 = vpop.f32.mrb[15].mxu1  ;;  %3225 = vmatmul.mubr.msk.f32.vlgmr.msra.gmra.mrb[6].mxu0 %vm1464_vm1, %v2037_v11  ;;  %v2490_v11 = vld [vmem:[#allocation13 + $0xe8] sm:$0xff] }
 0x6e2   : > { %2569 = vmatprep.mubr.f32.mxu0 %v3876_v41  ;;  %3337 = vmatpush1.bf16.msra.mxu0 %v3336_v35  ;;  %v2492_v12 = vld [vmem:[#allocation13 + $0xf8] sm:$0xff]  ;;  %v3370_v35 = vpack.c.bf16 %v2613_v33, %v2612_v32 }
 0x6e3   : > { %3339 = vmatprep.subr.bf16.mxu0 %v3338_v36  ;;  %v2596_v36 = vld [vmem:[#allocation14 + $0x10] sm:$0xff] }
 0x6e4   : > { %v2110_v13 = vpop.f32.mrb[16].mxu1  ;;  %v3372_v34 = vpack.c.bf16 %v2597_v38, %v2596_v36 }
 0x6e5   : > { %v3193_v14 = vpop.f32.mrb[17].mxu1  ;;  %3236 = vmatmul.mubr.msk.f32.vlgmr.msra.gmra.mrb[20].mxu1 %vm1464_vm1, %v2110_v13  ;;  %v3360_v13 = vpack.c.bf16 %v2487_v10, %v2485_v9  ;;  %v2608_v10 = vld [vmem:[#allocation14 + $0x70] sm:$0xff] }
 0x6e6   : > { %3341 = vmatpush1.bf16.msra.mxu0 %v3340_v47  ;;  %v3362_v14 = vpack.c.bf16 %v2492_v12, %v2490_v11  ;;  %v2609_v11 = vld [vmem:[#allocation14 + $0x78] sm:$0xff] }
 0x6e7   : > { %v3396_v12 = vpack.c.bf16 %v2609_v11, %v2608_v10 }
 0x78d   : > { %v2199_v15 = vpop.f32.mrb[4].mxu0 }
 0x78e   : > { %v3204_v16 = vpop.f32.mrb[5].mxu0 }
 0x78f   : > { %v2491_v16 = vld [vmem:[#allocation13 + $0xf0] sm:$0xff] }
 0x791   : > { %v2272_v17 = vpop.f32.mrb[18].mxu1 }
 0x792   : > { %v2422_v18 = vadd.f32 %v2272_v17, %v2199_v15  ;;  %v3215_v19 = vpop.f32.mrb[19].mxu1  ;;  %v2489_v15 = vld [vmem:[#allocation13 + $0xe0] sm:$0xff] }
 0x793   : > { %v3364_v17 = vpack.c.bf16 %v2491_v16, %v2489_v15  ;;  %v2611_v19 = vld [vmem:[#allocation14 + $0x88] sm:$0xff]  ;;  %v2501_v15 = vsub.s32 1, %v4374_v43 }
 0x7b4   : > { %v2345_v4 = vpop.f32.mrb[6].mxu0 }
 0x7b5   : > { %v2423_v20 = vadd.f32 %v2422_v18, %v2345_v4  ;;  %v3226_v21 = vpop.f32.mrb[7].mxu0  ;;  %v2610_v18 = vld [vmem:[#allocation14 + $0x80] sm:$0xff] }
 0x7b6   : > { %v2594_v4 = vld [vmem:[#allocation14] sm:$0xff]  ;;  %v2595_v21 = vld [vmem:[#allocation14 + $0x8] sm:$0xff] }
 0x7b8   : > { %v2418_v22 = vpop.f32.mrb[20].mxu1 }
 0x7b9   : > { %v2424_v24 = vadd.f32 %v2423_v20, %v2418_v22  ;;  %v3237_v25 = vpop.f32.mrb[21].mxu1  ;;  %v3366_v20 = vpack.c.bf16 %v2611_v19, %v2610_v18  ;;  %v3368_v22 = vpack.c.bf16 %v2595_v21, %v2594_v4 }
 0x7bb   : > { %v2432_v41 = vadd.f32 %v2919_v23, %v2424_v24  ;;  %3367 = vmatprep.subr.bf16.mxu1 %v3366_v20 }
 0x7bc   : > { %3369 = vmatpush3.bf16.msra.mxu1 %v3368_v22 }
 0x7bd   : > { %v4519_v26 = vadd.f32 %v2432_v41, %v4309_v0  ;;  %v3342_v0 = vpack.c.bf16 %v2472_v42, %v2470_v40  ;;  %3371 = vmatprep.subr.bf16.mxu1 %v3370_v35  ;;  %v2614_v40 = vld [vmem:[#allocation14 + $0xa0] sm:$0xff]  ;;  %v2615_v42 = vld [vmem:[#allocation14 + $0xa8] sm:$0xff] }
 0x7be   : > { %v3374_v47 = vpack.c.bf16 %v2615_v42, %v2614_v40  ;;  %v2922_v42 = vld [vmem:[%s4667_s20] ss:$0 sm:$0xff] }
 0x7bf   : > { %2436 = vadd.xlane.f32.xlu0 %v4519_v26  ;;  %3343 = vmatprep.subr.bf16.mxu0 %v3342_v0  ;;  %v2598_v0 = vld [vmem:[#allocation14 + $0x20] sm:$0xff] }
 0x7c0   : > { %3345 = vmatpush1.bf16.msra.mxu0 %v3344_v37  ;;  %3373 = vmatpush3.bf16.msra.mxu1 %v3372_v34  ;;  %v3376_v53 = vpack.c.bf16 %v2599_v44, %v2598_v0  ;;  %v2616_v37 = vld [vmem:[#allocation14 + $0xb0] sm:$0xff] }
 0x7c1   : > { %3347 = vmatprep.subr.bf16.mxu0 %v3346_v54  ;;  %3375 = vmatprep.subr.bf16.mxu1 %v3374_v47  ;;  %v2619_v54 = vld [vmem:[#allocation14 + $0xc8] sm:$0xff] }
 0x7c4   : > { %3349 = vmatpush1.bf16.msra.mxu0 %v3348_v56  ;;  %3377 = vmatpush3.bf16.msra.mxu1 %v3376_v53  ;;  %v3382_v56 = vpack.c.bf16 %v2619_v54, %v2618_v50 }
 0x7c5   : > { %3351 = vmatprep.subr.bf16.mxu0 %v3350_v59  ;;  %v3384_v59 = vpack.c.bf16 %v2603_v49, %v2602_v55 }
 0x7c8   : > { %3353 = vmatpush1.bf16.msra.mxu0 %v3352_v62  ;;  %v2622_v62 = vld [vmem:[#allocation14 + $0xe0] sm:$0xff] }
 0x7c9   : > { %3355 = vmatprep.subr.bf16.mxu0 %v3354_v3  ;;  %v3390_v2 = vpack.c.bf16 %v2623_v63, %v2622_v62  ;;  %v2606_v3 = vld [vmem:[#allocation14 + $0x60] sm:$0xff] }
 0x7cc   : > { %3357 = vmatpush1.bf16.msra.mxu0 %v3356_v7  ;;  %v2625_v7 = vld [vmem:[#allocation14 + $0xf8] sm:$0xff] }
 0x7cd   : > { %3359 = vmatprep.subr.bf16.mxu0 %v3358_v8  ;;  %v3392_v8 = vpack.c.bf16 %v2607_v5, %v2606_v3  ;;  %v3394_v9 = vpack.c.bf16 %v2625_v7, %v2624_v6 }
 0x7d0   : > { %3361 = vmatpush1.bf16.msra.mxu0 %v3360_v13  ;;  %v2497_v13 = vsub.s32 0, %v4374_v43 }
 0x7d1   : > { %3363 = vmatprep.subr.bf16.mxu0 %v3362_v14  ;;  %v2493_v14 = vld [vmem:[%s4666_s2] sm:$0x3] }
 0x7d2   : > { %v2498_v16 = vrot.slane %v2493_v14, %v2497_v13 }
 0x7d4   : > { %3365 = vmatpush1.bf16.msra.mxu0 %v3364_v17  ;;  %v2502_v17 = vrot.slane %v2493_v14, %v2501_v15 }
 0x84c   : > { %v2437_v45 = vpop.xlane.xlu0 %2436 }
 0x84d   : > { %v2438_v46 = vmul.f32 0.0078125, %v2437_v45  ;;  %v2617_v45 = vld [vmem:[#allocation14 + $0xb8] sm:$0xff] }
 0x84f   : > { %v2439_v48 = vsub.f32 %v4519_v26, %v2438_v46  ;;  %v3378_v46 = vpack.c.bf16 %v2617_v45, %v2616_v37 }
 0x851   : > { %v2440_v39 = vmul.f32 %v2439_v48, %v2439_v48  ;;  %3379 = vmatprep.subr.bf16.mxu1 %v3378_v46 }
 0x853   : > { %2441 = vadd.xlane.f32.xlu0 %v2440_v39  ;;  %v2601_v39 = vld [vmem:[#allocation14 + $0x38] sm:$0xff] }
 0x8e0   : > { %v2442_v23 = vpop.xlane.xlu0 %2441 }
 0x8e1   : > { %v2443_v24 = vmul.f32 0.0078125, %v2442_v23 }
 0x8e3   : > { %v2444_v25 = vadd.f32 1e-05, %v2443_v24 }
 0x8e5   : > { %3540 = vrsqrt.f32 %v2444_v25 }
 0x8ef   : > { %v3541_v41 = vpop.eup %3540 }
 0x8f0   : > { %v2446_v28 = vmul.f32 %v3541_v41, %v2439_v48  ;;  %v2600_v48 = vld [vmem:[#allocation14 + $0x30] sm:$0xff] }
 0x8f1   : > { %v3380_v52 = vpack.c.bf16 %v2601_v39, %v2600_v48 }
 0x8f2   : > { %v2453_v30 = vmul.f32 %v2920_v27, %v2446_v28 }
 0x8f3   : > { %3381 = vmatpush3.bf16.msra.mxu1 %v3380_v52 }
 0x8f4   : > { %v2460_v31 = vadd.f32 %v2921_v29, %v2453_v30  ;;  %3383 = vmatprep.subr.bf16.mxu1 %v3382_v56 }
 0x8f6   : > { %2570 = vmatmul.mubr.f32.vlgmr.msra.gmra.mrb[8].mxu0 %v2460_v31 }
 0x8f7   : > { %3385 = vmatpush3.bf16.msra.mxu1 %v3384_v59 }
 0x8f8   : > { %3387 = vmatprep.subr.bf16.mxu1 %v3386_v60 }
 0x8fb   : > { %3389 = vmatpush3.bf16.msra.mxu1 %v3388_v1 }
 0x8fc   : > { %3391 = vmatprep.subr.bf16.mxu1 %v3390_v2 }
 0x8ff   : > { %3393 = vmatpush3.bf16.msra.mxu1 %v3392_v8 }
 0x900   : > { %3395 = vmatprep.subr.bf16.mxu1 %v3394_v9 }
 0x903   : > { %3397 = vmatpush3.bf16.msra.mxu1 %v3396_v12 }
 0x9c9   : > { %v2571_v18 = vpop.f32.mrb[8].mxu0 }
 0x9ca   : > { %v2572_v19 = vadd.f32 %v2571_v18, %v2498_v16  ;;  %v2573_v4 = vpop.f32.mrb[9].mxu0 }
 0x9cb   : > { %v2574_v20 = vadd.f32 %v2573_v4, %v2502_v17 }
 0x9cc   : > { %v2578_v21 = vmul.f32 0.044715, %v2572_v19  ;;  %v2576_v36 = vmul.f32 0.5, %v2572_v19 }
 0x9cd   : > { %v2579_v22 = vmul.f32 0.044715, %v2574_v20  ;;  %v2577_v33 = vmul.f32 0.5, %v2574_v20 }
 0x9ce   : > { %v2580_v23 = vmul.f32 %v2578_v21, %v2572_v19 }
 0x9cf   : > { %v2581_v24 = vmul.f32 %v2579_v22, %v2574_v20 }
 0x9d0   : > { %v2582_v25 = vmul.f32 %v2580_v23, %v2572_v19 }
 0x9d1   : > { %v2583_v41 = vmul.f32 %v2581_v24, %v2574_v20 }
 0x9d2   : > { %v2584_v27 = vadd.f32 %v2582_v25, %v2572_v19 }
 0x9d3   : > { %v2585_v28 = vadd.f32 %v2583_v41, %v2574_v20 }
 0x9d4   : > { %v2586_v29 = vmul.f32 0.7978846, %v2584_v27 }
 0x9d5   : > { %v2587_v30 = vmul.f32 0.7978846, %v2585_v28 }
 0x9d6   : > { %3542 = vtanh.f32 %v2586_v29 }
 0x9d7   : > { %3544 = vtanh.f32 %v2587_v30 }
 0x9e0   : > { %v3543_v43 = vpop.eup %3542 }
 0x9e1   : > { %v3545_v31 = vpop.eup %3544  ;;  %v2590_v32 = vadd.f32 1.0, %v3543_v43 }
 0x9e2   : > { %v2591_v35 = vadd.f32 1.0, %v3545_v31 }
 0x9e3   : > { %v2592_v34 = vmul.f32 %v2590_v32, %v2576_v36 }
 0x9e4   : > { %v2593_v38 = vmul.f32 %v2591_v35, %v2577_v33 }
 0x9e6   : > { %2697 = vmatprep.mubr.f32.mxu1 %v2593_v38 }
 0x9e7   : > { %2698 = vmatmul.mubr.f32.vlgmr.msra.gmra.mrb[22].mxu1 %v2592_v34 }
 0xaba   : > { %v3046_v40 = vpop.f32.mrb[22].mxu1 }
 0xabb   : > { %v3047_v47 = vpop.f32.mrb[23].mxu1 }
 0xabc   : > { %v3048_v0 = vadd.f32 %v3047_v47, %v3046_v40 }
 0xabe   : > { %v2700_v44 = vadd.f32 %v3048_v0, %v2922_v42 }
 0xac0   : > { %v2703_v53 = vadd.f32 %v2700_v44, %v4519_v26 }
 0xac2   : > { %2704 = vst [vmem:[%s714_s19] sm:$0xff] %v2703_v53 }
 0xac3   : > { %3787 = shalt.err (!%p3784_p8)
}
 0xac4   : > { %s3788_s18 = scalar_lea.hbm %s4543_s22, 128  ;;  %s3792_s2 = scalar_lea.hbm %s4668_s12, 256 }
 0xac5   : > { %p3789_p9 = scmp.ne.s32.totalorder %s4543_s22, %s3788_s18  ;;  %p3793_p13 = scmp.lt.u32.totalorder %s4543_s22, %s4668_s12 }
 0xac6   : > { %p3794_p0 = scmp.lt.u32.totalorder %s3792_s2, %s3788_s18  ;;  %p3796_p4 = scmp.lt.u32.totalorder %s3788_s18, %s4543_s22 }
 0xac7   : > { %p3790_p12 = pnand %p3789_p9, %p4669_p10 }
 0xac8   : > { %p3795_p2 = por %p3794_p0, %p3793_p13 }
 0xac9   : > { %p3791_p1 = pneg %p3790_p12 }
 0xaca   : > { %p3797_p5 = por %p3796_p4, %p3795_p2 }
 0xacc   : > { %p3798_p7 = pnand %p3797_p5, %p3791_p1 }
 0xace   : > { %3801 = shalt.err (!%p3798_p7)
}
 0xacf   : > { %3426 = dma.vmem_to_hbm [thread:$0]  (%p4669_p10), %s4545_s13, 128, %s4543_s22, %s2706_s3  }
 0xad0 PF: > { %s2731_s20 = sand.u32 1, %s3848_s27   ;;  %p4670_p3 = scmp.ne.s32.totalorder %s4647_s23, 0 }
 0xad1   : > { %p4671_p6 = scmp.ge.s32.totalorder %s3860_s30, 2  ;;  %s2732_s0 = scalar_lea.sflag [#allocation4], %s2731_s20 }
 0xad3   : > { %p3455_p11 = pnand %p4671_p6, %p4670_p3 }
 0xad5   : > { %3843 = dma.done.wait (!%p3455_p11), %s2732_s0, 128  }
 0xad6   : > { %3845 = vsyncadd (!%p3455_p11), %s2732_s0, 4294967168  ;;  %s4672_s19 = sld [smem:[#allocation24_spill]]  ;;  %p37_p8 = scmp.ge.s32.totalorder %s4169_s21, 4  }
 0xad7   : > { %s4673_s27 = smov %s3852_s28  ;;  %s4674_s28 = smov %s3856_s29 }
 0xad8   : > { %s4676_s30 = smov %s4169_s21  ;;  %39 = sbr.rel (!%p37_p8) target bundleno = 27 (0x1b), region = 174 }
 0xadc   : > { %s4675_s29 = smov %s4672_s19 }
 0xadf   :  { %2737 = vsyncpa [#allocation3], 1 }
 0xae0   :  { %2739 = vsyncpa [#allocation3 + $0x1], 1 }
 0xae1   :  { %2740 = vsyncpa [#allocation6], 1 }
 0xae2   :  { %2742 = vsyncpa [#allocation6 + $0x1], 1 }
 0xae3   :  { %2743 = vsyncpa [#allocation9], 1 }
 0xae4   :  { %2744 = vsyncpa [#allocation12], 1 }
 0xae5   :  { %2745 = vsyncpa [#allocation15], 1 }
 0xae6   :  { %2746 = vsyncpa [#allocation4], 1 }
 0xae7   :  { %2748 = vsyncpa [#allocation4 + $0x1], 1 }

</bundles_post_ra>
